<compile_context>
chip_gen: v6e
topology: v6e:2x2x1
jax: 0.10.0
libtpu: 0.0.40
codegen_flags: <defaults>
</compile_context>

<pallas_src>
import math

import jax
import jax.numpy as jnp
from jax.experimental import pallas as pl
from jax.experimental.pallas import tpu as pltpu

D_MODEL = 32
HEADS = 4
D_K = D_MODEL // HEADS
D_FF = 64
LN_EPS = 1e-5
SCALE = 1.0 / math.sqrt(D_K)


# ----------------------------------------------------------------------------
# Fused Pallas kernel: one grid step == one batch element, whole layer in VMEM.
# ----------------------------------------------------------------------------
def _cross_attention_layer_kernel(
    x_ref,      # [1, Sx, D]
    m_ref,      # [1, Sm, D]
    ln_g_ref,   # [5, 1, D]   (self_attn, self_attn_mem, cross_attn, ff, ff_mem)
    ln_b_ref,   # [5, 1, D]
    wqkv_ref,   # [3, D, 3D]  fused q|k|v projection per MHA
    bqkv_ref,   # [3, 1, 3D]
    wo_ref,     # [3, D, D]
    bo_ref,     # [3, 1, D]
    w1_ref,     # [2, D, D_FF]
    b1_ref,     # [2, 1, D_FF]
    w2_ref,     # [2, D_FF, D]
    b2_ref,     # [2, 1, D]
    xo_ref,     # [1, Sx, D]
    mo_ref,     # [1, Sm, D]
):
    Sx = x_ref.shape[1]
    Sm = m_ref.shape[1]

    def layer_norm(z, idx):
        # z: [S, D] f32.  Biased variance (PyTorch LayerNorm).  Keep stats in f32
        # (v5e has no bf16 VPU/EUP path).
        g = ln_g_ref[idx]          # [1, D]
        b = ln_b_ref[idx]          # [1, D]
        mu = jnp.mean(z, axis=-1, keepdims=True)
        var = jnp.mean((z - mu) ** 2, axis=-1, keepdims=True)
        return (z - mu) * jax.lax.rsqrt(var + LN_EPS) * g + b

    def mha(z, idx):
        # z: [S, D] f32 — self attention (q = k = v = z), mask = None.
        # Fused QKV: one lane-dense [D, 3D] matmul instead of three [D, D] ones.
        qkv = jnp.dot(z, wqkv_ref[idx], preferred_element_type=jnp.float32)
        qkv = qkv + bqkv_ref[idx]                                  # [S, 3D]
        heads = []
        for h in range(HEADS):                                     # static unroll
            qh = qkv[:, h * D_K:(h + 1) * D_K]                     # [S, d_k]
            kh = qkv[:, D_MODEL + h * D_K:D_MODEL + (h + 1) * D_K]
            vh = qkv[:, 2 * D_MODEL + h * D_K:2 * D_MODEL + (h + 1) * D_K]
            # Contract last dims directly (no materialized k.T).
            s = jax.lax.dot_general(
                qh, kh, (((1,), (1,)), ((), ())),
                preferred_element_type=jnp.float32) * SCALE        # [S, S]
            mmax = jnp.max(s, axis=-1, keepdims=True)
            p = jnp.exp(s - mmax)
            l = jnp.sum(p, axis=-1, keepdims=True)
            # approx=True moves this to the EUP slot; kept exact here so the
            # kernel is bit-comparable to the f32 reference.
            p = p * pl.reciprocal(l, approx=False)
            heads.append(jnp.dot(p, vh, preferred_element_type=jnp.float32))
        o = jnp.concatenate(heads, axis=-1)                        # [S, D]
        return jnp.dot(o, wo_ref[idx],
                       preferred_element_type=jnp.float32) + bo_ref[idx]

    def feed_forward(z, idx):
        h1 = jnp.dot(z, w1_ref[idx], preferred_element_type=jnp.float32)
        h1 = jnp.maximum(h1 + b1_ref[idx], 0.0)
        return jnp.dot(h1, w2_ref[idx],
                       preferred_element_type=jnp.float32) + b2_ref[idx]

    x = x_ref[0].astype(jnp.float32)       # [Sx, D]
    m = m_ref[0].astype(jnp.float32)       # [Sm, D]

    # x = x + self_attn(norm(x))            (residual fused in-kernel)
    x = x + mha(layer_norm(x, 0), 0)

    # memory = memory + self_attn_mem(norm(memory))
    m = m + mha(layer_norm(m, 1), 1)

    # joint attention over concat along the sequence axis (in VMEM, no HBM copy)
    h = jnp.concatenate([x, m], axis=0)    # [Sx+Sm, D]
    h = h + mha(layer_norm(h, 2), 2)
    x = h[:Sx]
    m = h[Sx:]

    # x = x + ff(norm(x))
    x = x + feed_forward(layer_norm(x, 3), 0)

    # memory = memory + ff_mem(norm(memory))
    m = m + feed_forward(layer_norm(m, 4), 1)

    xo_ref[0] = x.astype(xo_ref.dtype)
    mo_ref[0] = m.astype(mo_ref.dtype)


# ----------------------------------------------------------------------------
# Wrapper: pack params, one pallas_call, batch axis marked "parallel".
# ----------------------------------------------------------------------------
def cross_attention_layer(x, memory, p):
    # x: [Sx, B, D], memory: [Sm, B, D]  (PyTorch module convention)
    Sx, B, D = x.shape
    Sm = memory.shape[0]

    xb = jnp.transpose(x, (1, 0, 2))        # [B, Sx, D]
    mb = jnp.transpose(memory, (1, 0, 2))   # [B, Sm, D]

    batch_x = pl.BlockSpec((1, Sx, D), lambda b: (b, 0, 0))
    batch_m = pl.BlockSpec((1, Sm, D), lambda b: (b, 0, 0))

    def full(shape):
        return pl.BlockSpec(shape, lambda b: (0,) * len(shape))

    xo, mo = pl.pallas_call(
        _cross_attention_layer_kernel,
        grid=(B,),
        in_specs=[
            batch_x,                         # x
            batch_m,                         # memory
            full((5, 1, D)),                 # ln_g
            full((5, 1, D)),                 # ln_b
            full((3, D, 3 * D)),             # wqkv
            full((3, 1, 3 * D)),             # bqkv
            full((3, D, D)),                 # wo
            full((3, 1, D)),                 # bo
            full((2, D, D_FF)),              # w1
            full((2, 1, D_FF)),              # b1
            full((2, D_FF, D)),              # w2
            full((2, 1, D)),                 # b2
        ],
        out_specs=[batch_x, batch_m],
        out_shape=[
            jax.ShapeDtypeStruct((B, Sx, D), x.dtype),
            jax.ShapeDtypeStruct((B, Sm, D), memory.dtype),
        ],
        compiler_params=pltpu.CompilerParams(
            dimension_semantics=("parallel",)),   # 2 TCs on v7x
    )(xb, mb, p["ln_g"], p["ln_b"], p["wqkv"], p["bqkv"], p["wo"], p["bo"],
      p["w1"], p["b1"], p["w2"], p["b2"])

    return jnp.transpose(xo, (1, 0, 2)), jnp.transpose(mo, (1, 0, 2))


# ----------------------------------------------------------------------------
# Deterministic parameter init (xavier-uniform for matrices, zeros for biases,
# ones/zeros for LayerNorm), packed into the fused-kernel layout.
# ----------------------------------------------------------------------------
def xavier_uniform(key, fan_in, fan_out):
    bound = math.sqrt(6.0 / (fan_in + fan_out))
    return jax.random.uniform(key, (fan_in, fan_out), jnp.float32, -bound, bound)


def _mha_raw(key):
    ks = jax.random.split(key, 4)
    return dict(
        wq=xavier_uniform(ks[0], D_MODEL, D_MODEL), bq=jnp.zeros((D_MODEL,), jnp.float32),
        wk=xavier_uniform(ks[1], D_MODEL, D_MODEL), bk=jnp.zeros((D_MODEL,), jnp.float32),
        wv=xavier_uniform(ks[2], D_MODEL, D_MODEL), bv=jnp.zeros((D_MODEL,), jnp.float32),
        wo=xavier_uniform(ks[3], D_MODEL, D_MODEL), bo=jnp.zeros((D_MODEL,), jnp.float32),
    )


def _ff_raw(key):
    k1, k2 = jax.random.split(key)
    return dict(
        w1=xavier_uniform(k1, D_MODEL, D_FF), b1=jnp.zeros((D_FF,), jnp.float32),
        w2=xavier_uniform(k2, D_FF, D_MODEL), b2=jnp.zeros((D_MODEL,), jnp.float32),
    )


def make_params(key):
    ks = jax.random.split(key, 5)
    mhas = [_mha_raw(ks[0]), _mha_raw(ks[1]), _mha_raw(ks[2])]   # self, self_mem, cross
    ffs = [_ff_raw(ks[3]), _ff_raw(ks[4])]                       # ff, ff_mem
    return dict(
        ln_g=jnp.ones((5, 1, D_MODEL), jnp.float32),
        ln_b=jnp.zeros((5, 1, D_MODEL), jnp.float32),
        wqkv=jnp.stack([jnp.concatenate([a["wq"], a["wk"], a["wv"]], axis=1) for a in mhas]),
        bqkv=jnp.stack([jnp.concatenate([a["bq"], a["bk"], a["bv"]])[None, :] for a in mhas]),
        wo=jnp.stack([a["wo"] for a in mhas]),
        bo=jnp.stack([a["bo"][None, :] for a in mhas]),
        w1=jnp.stack([f["w1"] for f in ffs]),
        b1=jnp.stack([f["b1"][None, :] for f in ffs]),
        w2=jnp.stack([f["w2"] for f in ffs]),
        b2=jnp.stack([f["b2"][None, :] for f in ffs]),
    )


# ----------------------------------------------------------------------------
# Pure-JAX reference (mirrors the PyTorch forward) for a self-check.
# ----------------------------------------------------------------------------
def reference_layer(x, memory, p):
    hp = jax.lax.Precision.HIGHEST

    def ln(z, i):
        mu = jnp.mean(z, -1, keepdims=True)
        var = jnp.mean((z - mu) ** 2, -1, keepdims=True)
        return (z - mu) * jax.lax.rsqrt(var + LN_EPS) * p["ln_g"][i, 0] + p["ln_b"][i, 0]

    def mha(z, i):
        S, B, _ = z.shape
        qkv = jnp.einsum("sbd,de->sbe", z, p["wqkv"][i], precision=hp) + p["bqkv"][i, 0]
        q = qkv[..., :D_MODEL].reshape(S, B, HEADS, D_K)
        k = qkv[..., D_MODEL:2 * D_MODEL].reshape(S, B, HEADS, D_K)
        v = qkv[..., 2 * D_MODEL:].reshape(S, B, HEADS, D_K)
        s = jnp.einsum("qbhd,kbhd->bhqk", q, k, precision=hp) * SCALE
        a = jax.nn.softmax(s, axis=-1)
        o = jnp.einsum("bhqk,kbhd->qbhd", a, v, precision=hp).reshape(S, B, D_MODEL)
        return jnp.einsum("sbd,de->sbe", o, p["wo"][i], precision=hp) + p["bo"][i, 0]

    def ff(z, i):
        h = jnp.maximum(jnp.einsum("sbd,df->sbf", z, p["w1"][i], precision=hp) + p["b1"][i, 0], 0.0)
        return jnp.einsum("sbf,fd->sbd", h, p["w2"][i], precision=hp) + p["b2"][i, 0]

    x = x + mha(ln(x, 0), 0)
    memory = memory + mha(ln(memory, 1), 1)
    lx = x.shape[0]
    h = jnp.concatenate([x, memory], axis=0)
    h = h + mha(ln(h, 2), 2)
    x, memory = h[:lx], h[lx:]
    x = x + ff(ln(x, 3), 0)
    memory = memory + ff(ln(memory, 4), 1)
    return x, memory


if __name__ == "__main__":
    key = jax.random.PRNGKey(0)
    k_x, k_m, k_p = jax.random.split(key, 3)

    SEQ_X, SEQ_MEM, BATCH = 8, 8, 2
    x = jax.random.normal(k_x, (SEQ_X, BATCH, D_MODEL), dtype=jnp.float32)
    memory = jax.random.normal(k_m, (SEQ_MEM, BATCH, D_MODEL), dtype=jnp.float32)
    params = make_params(k_p)

    fwd = jax.jit(cross_attention_layer)
    x_out, mem_out = fwd(x, memory, params)
    jax.block_until_ready((x_out, mem_out))

    assert x_out.shape == (SEQ_X, BATCH, D_MODEL)
    assert mem_out.shape == (SEQ_MEM, BATCH, D_MODEL)

    x_ref, mem_ref = reference_layer(x, memory, params)
    assert jnp.allclose(x_out, x_ref, atol=2e-4, rtol=2e-4)
    assert jnp.allclose(mem_out, mem_ref, atol=2e-4, rtol=2e-4)
    print("KERNEL_OK")
</pallas_src>

<mosaic_0001>
module attributes {stable_mosaic.version = 11 : i64} {
  func.func @_cross_attention_layer_kernel(%arg0: i32, %arg1: memref<1x8x32xf32, #tpu.memory_space<vmem>>, %arg2: memref<1x8x32xf32, #tpu.memory_space<vmem>>, %arg3: memref<5x1x32xf32, #tpu.memory_space<vmem>>, %arg4: memref<5x1x32xf32, #tpu.memory_space<vmem>>, %arg5: memref<3x32x96xf32, #tpu.memory_space<vmem>>, %arg6: memref<3x1x96xf32, #tpu.memory_space<vmem>>, %arg7: memref<3x32x32xf32, #tpu.memory_space<vmem>>, %arg8: memref<3x1x32xf32, #tpu.memory_space<vmem>>, %arg9: memref<2x32x64xf32, #tpu.memory_space<vmem>>, %arg10: memref<2x1x64xf32, #tpu.memory_space<vmem>>, %arg11: memref<2x64x32xf32, #tpu.memory_space<vmem>>, %arg12: memref<2x1x32xf32, #tpu.memory_space<vmem>>, %arg13: memref<1x8x32xf32, #tpu.memory_space<vmem>>, %arg14: memref<1x8x32xf32, #tpu.memory_space<vmem>>) attributes {dimension_semantics = [#tpu.dimension_semantics<parallel>], iteration_bounds = array<i64: 2>, scalar_prefetch = 0 : i64, scratch_operands = 0 : i64, tpu.core_type = #tpu.core_type<tc>, window_params = [{transform_indices = @transform_0, window_bounds = array<i64: 1, 8, 32>}, {transform_indices = @transform_1, window_bounds = array<i64: 1, 8, 32>}, {pipeline_mode = #tpu.pipeline_mode<synchronous>, transform_indices = @transform_2, window_bounds = array<i64: 5, 1, 32>}, {pipeline_mode = #tpu.pipeline_mode<synchronous>, transform_indices = @transform_3, window_bounds = array<i64: 5, 1, 32>}, {pipeline_mode = #tpu.pipeline_mode<synchronous>, transform_indices = @transform_4, window_bounds = array<i64: 3, 32, 96>}, {pipeline_mode = #tpu.pipeline_mode<synchronous>, transform_indices = @transform_5, window_bounds = array<i64: 3, 1, 96>}, {pipeline_mode = #tpu.pipeline_mode<synchronous>, transform_indices = @transform_6, window_bounds = array<i64: 3, 32, 32>}, {pipeline_mode = #tpu.pipeline_mode<synchronous>, transform_indices = @transform_7, window_bounds = array<i64: 3, 1, 32>}, {pipeline_mode = #tpu.pipeline_mode<synchronous>, transform_indices = @transform_8, window_bounds = array<i64: 2, 32, 64>}, {pipeline_mode = #tpu.pipeline_mode<synchronous>, transform_indices = @transform_9, window_bounds = array<i64: 2, 1, 64>}, {pipeline_mode = #tpu.pipeline_mode<synchronous>, transform_indices = @transform_10, window_bounds = array<i64: 2, 64, 32>}, {pipeline_mode = #tpu.pipeline_mode<synchronous>, transform_indices = @transform_11, window_bounds = array<i64: 2, 1, 32>}, {transform_indices = @transform_12, window_bounds = array<i64: 1, 8, 32>}, {transform_indices = @transform_13, window_bounds = array<i64: 1, 8, 32>}]} {
    %c0 = arith.constant 0 : index
    %c0_0 = arith.constant 0 : index
    %c0_1 = arith.constant 0 : index
    %0 = vector.load %arg1[%c0, %c0_0, %c0_1] : memref<1x8x32xf32, #tpu.memory_space<vmem>>, vector<1x8x32xf32>
    %1 = vector.shape_cast %0 : vector<1x8x32xf32> to vector<8x32xf32>
    %c0_2 = arith.constant 0 : index
    %c0_3 = arith.constant 0 : index
    %c0_4 = arith.constant 0 : index
    %2 = vector.load %arg2[%c0_2, %c0_3, %c0_4] : memref<1x8x32xf32, #tpu.memory_space<vmem>>, vector<1x8x32xf32>
    %3 = vector.shape_cast %2 : vector<1x8x32xf32> to vector<8x32xf32>
    %c0_5 = arith.constant 0 : index
    %c0_6 = arith.constant 0 : index
    %c0_7 = arith.constant 0 : index
    %4 = vector.load %arg3[%c0_5, %c0_6, %c0_7] : memref<5x1x32xf32, #tpu.memory_space<vmem>>, vector<1x1x32xf32>
    %5 = vector.shape_cast %4 : vector<1x1x32xf32> to vector<1x32xf32>
    %c0_8 = arith.constant 0 : index
    %c0_9 = arith.constant 0 : index
    %c0_10 = arith.constant 0 : index
    %6 = vector.load %arg4[%c0_8, %c0_9, %c0_10] : memref<5x1x32xf32, #tpu.memory_space<vmem>>, vector<1x1x32xf32>
    %7 = vector.shape_cast %6 : vector<1x1x32xf32> to vector<1x32xf32>
    %cst = arith.constant dense<0.000000e+00> : vector<8xf32>
    %8 = vector.multi_reduction <add>, %1, %cst [1] : vector<8x32xf32> to vector<8xf32>
    %9 = vector.shape_cast %8 : vector<8xf32> to vector<8x1xf32>
    %cst_11 = arith.constant 3.200000e+01 : f32
    %10 = vector.broadcast %cst_11 : f32 to vector<8x1xf32>
    %11 = arith.divf %9, %10 : vector<8x1xf32>
    %12 = vector.broadcast %11 : vector<8x1xf32> to vector<8x32xf32>
    %13 = arith.subf %1, %12 : vector<8x32xf32>
    %14 = arith.mulf %13, %13 : vector<8x32xf32>
    %cst_12 = arith.constant dense<0.000000e+00> : vector<8xf32>
    %15 = vector.multi_reduction <add>, %14, %cst_12 [1] : vector<8x32xf32> to vector<8xf32>
    %16 = vector.shape_cast %15 : vector<8xf32> to vector<8x1xf32>
    %cst_13 = arith.constant 3.200000e+01 : f32
    %17 = vector.broadcast %cst_13 : f32 to vector<8x1xf32>
    %18 = arith.divf %16, %17 : vector<8x1xf32>
    %19 = vector.broadcast %11 : vector<8x1xf32> to vector<8x32xf32>
    %20 = arith.subf %1, %19 : vector<8x32xf32>
    %cst_14 = arith.constant 9.99999974E-6 : f32
    %21 = vector.broadcast %cst_14 : f32 to vector<8x1xf32>
    %22 = arith.addf %18, %21 : vector<8x1xf32>
    %23 = math.rsqrt %22 : vector<8x1xf32>
    %24 = vector.broadcast %23 : vector<8x1xf32> to vector<8x32xf32>
    %25 = arith.mulf %20, %24 : vector<8x32xf32>
    %26 = vector.broadcast %5 : vector<1x32xf32> to vector<8x32xf32>
    %27 = arith.mulf %25, %26 : vector<8x32xf32>
    %28 = vector.broadcast %7 : vector<1x32xf32> to vector<8x32xf32>
    %29 = arith.addf %27, %28 : vector<8x32xf32>
    %c0_15 = arith.constant 0 : index
    %c0_16 = arith.constant 0 : index
    %c0_17 = arith.constant 0 : index
    %30 = vector.load %arg5[%c0_15, %c0_16, %c0_17] : memref<3x32x96xf32, #tpu.memory_space<vmem>>, vector<1x32x96xf32>
    %31 = vector.shape_cast %30 : vector<1x32x96xf32> to vector<32x96xf32>
    %cst_18 = arith.constant dense<0.000000e+00> : vector<8x96xf32>
    %32 = tpu.matmul %29, %31, %cst_18 {dimension_numbers = #tpu.dot_dimension_numbers<[1], [0], [0], [1], [0, 0, 1, 1], [], []>} : vector<8x32xf32>, vector<32x96xf32>, vector<8x96xf32> -> vector<8x96xf32>
    %c0_19 = arith.constant 0 : index
    %c0_20 = arith.constant 0 : index
    %c0_21 = arith.constant 0 : index
    %33 = vector.load %arg6[%c0_19, %c0_20, %c0_21] : memref<3x1x96xf32, #tpu.memory_space<vmem>>, vector<1x1x96xf32>
    %34 = vector.shape_cast %33 : vector<1x1x96xf32> to vector<1x96xf32>
    %35 = vector.broadcast %34 : vector<1x96xf32> to vector<8x96xf32>
    %36 = arith.addf %32, %35 : vector<8x96xf32>
    %37 = vector.extract_strided_slice %36 {offsets = [0, 0], sizes = [8, 8], strides = [1, 1]} : vector<8x96xf32> to vector<8x8xf32>
    %38 = vector.extract_strided_slice %36 {offsets = [0, 32], sizes = [8, 8], strides = [1, 1]} : vector<8x96xf32> to vector<8x8xf32>
    %39 = vector.extract_strided_slice %36 {offsets = [0, 64], sizes = [8, 8], strides = [1, 1]} : vector<8x96xf32> to vector<8x8xf32>
    %cst_22 = arith.constant dense<0.000000e+00> : vector<8x8xf32>
    %40 = tpu.matmul %37, %38, %cst_22 {dimension_numbers = #tpu.dot_dimension_numbers<[1], [1], [0], [0], [0, 0, 1, 0], [], []>} : vector<8x8xf32>, vector<8x8xf32>, vector<8x8xf32> -> vector<8x8xf32>
    %cst_23 = arith.constant 0.353553385 : f32
    %41 = vector.broadcast %cst_23 : f32 to vector<8x8xf32>
    %42 = arith.mulf %40, %41 : vector<8x8xf32>
    %cst_24 = arith.constant dense<0xFF800000> : vector<8xf32>
    %43 = vector.multi_reduction <maximumf>, %42, %cst_24 [1] : vector<8x8xf32> to vector<8xf32>
    %44 = vector.shape_cast %43 : vector<8xf32> to vector<8x1xf32>
    %45 = vector.broadcast %44 : vector<8x1xf32> to vector<8x8xf32>
    %46 = arith.subf %42, %45 : vector<8x8xf32>
    %47 = math.exp %46 : vector<8x8xf32>
    %cst_25 = arith.constant dense<0.000000e+00> : vector<8xf32>
    %48 = vector.multi_reduction <add>, %47, %cst_25 [1] : vector<8x8xf32> to vector<8xf32>
    %49 = vector.shape_cast %48 : vector<8xf32> to vector<8x1xf32>
    %50 = tpu.reciprocal %49 : vector<8x1xf32> -> vector<8x1xf32>
    %51 = vector.broadcast %50 : vector<8x1xf32> to vector<8x8xf32>
    %52 = arith.mulf %47, %51 : vector<8x8xf32>
    %cst_26 = arith.constant dense<0.000000e+00> : vector<8x8xf32>
    %53 = tpu.matmul %52, %39, %cst_26 {dimension_numbers = #tpu.dot_dimension_numbers<[1], [0], [0], [1], [0, 0, 1, 1], [], []>} : vector<8x8xf32>, vector<8x8xf32>, vector<8x8xf32> -> vector<8x8xf32>
    %54 = vector.extract_strided_slice %36 {offsets = [0, 8], sizes = [8, 8], strides = [1, 1]} : vector<8x96xf32> to vector<8x8xf32>
    %55 = vector.extract_strided_slice %36 {offsets = [0, 40], sizes = [8, 8], strides = [1, 1]} : vector<8x96xf32> to vector<8x8xf32>
    %56 = vector.extract_strided_slice %36 {offsets = [0, 72], sizes = [8, 8], strides = [1, 1]} : vector<8x96xf32> to vector<8x8xf32>
    %cst_27 = arith.constant dense<0.000000e+00> : vector<8x8xf32>
    %57 = tpu.matmul %54, %55, %cst_27 {dimension_numbers = #tpu.dot_dimension_numbers<[1], [1], [0], [0], [0, 0, 1, 0], [], []>} : vector<8x8xf32>, vector<8x8xf32>, vector<8x8xf32> -> vector<8x8xf32>
    %cst_28 = arith.constant 0.353553385 : f32
    %58 = vector.broadcast %cst_28 : f32 to vector<8x8xf32>
    %59 = arith.mulf %57, %58 : vector<8x8xf32>
    %cst_29 = arith.constant dense<0xFF800000> : vector<8xf32>
    %60 = vector.multi_reduction <maximumf>, %59, %cst_29 [1] : vector<8x8xf32> to vector<8xf32>
    %61 = vector.shape_cast %60 : vector<8xf32> to vector<8x1xf32>
    %62 = vector.broadcast %61 : vector<8x1xf32> to vector<8x8xf32>
    %63 = arith.subf %59, %62 : vector<8x8xf32>
    %64 = math.exp %63 : vector<8x8xf32>
    %cst_30 = arith.constant dense<0.000000e+00> : vector<8xf32>
    %65 = vector.multi_reduction <add>, %64, %cst_30 [1] : vector<8x8xf32> to vector<8xf32>
    %66 = vector.shape_cast %65 : vector<8xf32> to vector<8x1xf32>
    %67 = tpu.reciprocal %66 : vector<8x1xf32> -> vector<8x1xf32>
    %68 = vector.broadcast %67 : vector<8x1xf32> to vector<8x8xf32>
    %69 = arith.mulf %64, %68 : vector<8x8xf32>
    %cst_31 = arith.constant dense<0.000000e+00> : vector<8x8xf32>
    %70 = tpu.matmul %69, %56, %cst_31 {dimension_numbers = #tpu.dot_dimension_numbers<[1], [0], [0], [1], [0, 0, 1, 1], [], []>} : vector<8x8xf32>, vector<8x8xf32>, vector<8x8xf32> -> vector<8x8xf32>
    %71 = vector.extract_strided_slice %36 {offsets = [0, 16], sizes = [8, 8], strides = [1, 1]} : vector<8x96xf32> to vector<8x8xf32>
    %72 = vector.extract_strided_slice %36 {offsets = [0, 48], sizes = [8, 8], strides = [1, 1]} : vector<8x96xf32> to vector<8x8xf32>
    %73 = vector.extract_strided_slice %36 {offsets = [0, 80], sizes = [8, 8], strides = [1, 1]} : vector<8x96xf32> to vector<8x8xf32>
    %cst_32 = arith.constant dense<0.000000e+00> : vector<8x8xf32>
    %74 = tpu.matmul %71, %72, %cst_32 {dimension_numbers = #tpu.dot_dimension_numbers<[1], [1], [0], [0], [0, 0, 1, 0], [], []>} : vector<8x8xf32>, vector<8x8xf32>, vector<8x8xf32> -> vector<8x8xf32>
    %cst_33 = arith.constant 0.353553385 : f32
    %75 = vector.broadcast %cst_33 : f32 to vector<8x8xf32>
    %76 = arith.mulf %74, %75 : vector<8x8xf32>
    %cst_34 = arith.constant dense<0xFF800000> : vector<8xf32>
    %77 = vector.multi_reduction <maximumf>, %76, %cst_34 [1] : vector<8x8xf32> to vector<8xf32>
    %78 = vector.shape_cast %77 : vector<8xf32> to vector<8x1xf32>
    %79 = vector.broadcast %78 : vector<8x1xf32> to vector<8x8xf32>
    %80 = arith.subf %76, %79 : vector<8x8xf32>
    %81 = math.exp %80 : vector<8x8xf32>
    %cst_35 = arith.constant dense<0.000000e+00> : vector<8xf32>
    %82 = vector.multi_reduction <add>, %81, %cst_35 [1] : vector<8x8xf32> to vector<8xf32>
    %83 = vector.shape_cast %82 : vector<8xf32> to vector<8x1xf32>
    %84 = tpu.reciprocal %83 : vector<8x1xf32> -> vector<8x1xf32>
    %85 = vector.broadcast %84 : vector<8x1xf32> to vector<8x8xf32>
    %86 = arith.mulf %81, %85 : vector<8x8xf32>
    %cst_36 = arith.constant dense<0.000000e+00> : vector<8x8xf32>
    %87 = tpu.matmul %86, %73, %cst_36 {dimension_numbers = #tpu.dot_dimension_numbers<[1], [0], [0], [1], [0, 0, 1, 1], [], []>} : vector<8x8xf32>, vector<8x8xf32>, vector<8x8xf32> -> vector<8x8xf32>
    %88 = vector.extract_strided_slice %36 {offsets = [0, 24], sizes = [8, 8], strides = [1, 1]} : vector<8x96xf32> to vector<8x8xf32>
    %89 = vector.extract_strided_slice %36 {offsets = [0, 56], sizes = [8, 8], strides = [1, 1]} : vector<8x96xf32> to vector<8x8xf32>
    %90 = vector.extract_strided_slice %36 {offsets = [0, 88], sizes = [8, 8], strides = [1, 1]} : vector<8x96xf32> to vector<8x8xf32>
    %cst_37 = arith.constant dense<0.000000e+00> : vector<8x8xf32>
    %91 = tpu.matmul %88, %89, %cst_37 {dimension_numbers = #tpu.dot_dimension_numbers<[1], [1], [0], [0], [0, 0, 1, 0], [], []>} : vector<8x8xf32>, vector<8x8xf32>, vector<8x8xf32> -> vector<8x8xf32>
    %cst_38 = arith.constant 0.353553385 : f32
    %92 = vector.broadcast %cst_38 : f32 to vector<8x8xf32>
    %93 = arith.mulf %91, %92 : vector<8x8xf32>
    %cst_39 = arith.constant dense<0xFF800000> : vector<8xf32>
    %94 = vector.multi_reduction <maximumf>, %93, %cst_39 [1] : vector<8x8xf32> to vector<8xf32>
    %95 = vector.shape_cast %94 : vector<8xf32> to vector<8x1xf32>
    %96 = vector.broadcast %95 : vector<8x1xf32> to vector<8x8xf32>
    %97 = arith.subf %93, %96 : vector<8x8xf32>
    %98 = math.exp %97 : vector<8x8xf32>
    %cst_40 = arith.constant dense<0.000000e+00> : vector<8xf32>
    %99 = vector.multi_reduction <add>, %98, %cst_40 [1] : vector<8x8xf32> to vector<8xf32>
    %100 = vector.shape_cast %99 : vector<8xf32> to vector<8x1xf32>
    %101 = tpu.reciprocal %100 : vector<8x1xf32> -> vector<8x1xf32>
    %102 = vector.broadcast %101 : vector<8x1xf32> to vector<8x8xf32>
    %103 = arith.mulf %98, %102 : vector<8x8xf32>
    %cst_41 = arith.constant dense<0.000000e+00> : vector<8x8xf32>
    %104 = tpu.matmul %103, %90, %cst_41 {dimension_numbers = #tpu.dot_dimension_numbers<[1], [0], [0], [1], [0, 0, 1, 1], [], []>} : vector<8x8xf32>, vector<8x8xf32>, vector<8x8xf32> -> vector<8x8xf32>
    %105 = tpu.concatenate %53, %70, %87, %104 in 1 : vector<8x8xf32>, vector<8x8xf32>, vector<8x8xf32>, vector<8x8xf32> -> vector<8x32xf32>
    %c0_42 = arith.constant 0 : index
    %c0_43 = arith.constant 0 : index
    %c0_44 = arith.constant 0 : index
    %106 = vector.load %arg7[%c0_42, %c0_43, %c0_44] : memref<3x32x32xf32, #tpu.memory_space<vmem>>, vector<1x32x32xf32>
    %107 = vector.shape_cast %106 : vector<1x32x32xf32> to vector<32x32xf32>
    %cst_45 = arith.constant dense<0.000000e+00> : vector<8x32xf32>
    %108 = tpu.matmul %105, %107, %cst_45 {dimension_numbers = #tpu.dot_dimension_numbers<[1], [0], [0], [1], [0, 0, 1, 1], [], []>} : vector<8x32xf32>, vector<32x32xf32>, vector<8x32xf32> -> vector<8x32xf32>
    %c0_46 = arith.constant 0 : index
    %c0_47 = arith.constant 0 : index
    %c0_48 = arith.constant 0 : index
    %109 = vector.load %arg8[%c0_46, %c0_47, %c0_48] : memref<3x1x32xf32, #tpu.memory_space<vmem>>, vector<1x1x32xf32>
    %110 = vector.shape_cast %109 : vector<1x1x32xf32> to vector<1x32xf32>
    %111 = vector.broadcast %110 : vector<1x32xf32> to vector<8x32xf32>
    %112 = arith.addf %108, %111 : vector<8x32xf32>
    %113 = arith.addf %1, %112 : vector<8x32xf32>
    %c1 = arith.constant 1 : index
    %c0_49 = arith.constant 0 : index
    %c0_50 = arith.constant 0 : index
    %114 = vector.load %arg3[%c1, %c0_49, %c0_50] : memref<5x1x32xf32, #tpu.memory_space<vmem>>, vector<1x1x32xf32>
    %115 = vector.shape_cast %114 : vector<1x1x32xf32> to vector<1x32xf32>
    %c1_51 = arith.constant 1 : index
    %c0_52 = arith.constant 0 : index
    %c0_53 = arith.constant 0 : index
    %116 = vector.load %arg4[%c1_51, %c0_52, %c0_53] : memref<5x1x32xf32, #tpu.memory_space<vmem>>, vector<1x1x32xf32>
    %117 = vector.shape_cast %116 : vector<1x1x32xf32> to vector<1x32xf32>
    %cst_54 = arith.constant dense<0.000000e+00> : vector<8xf32>
    %118 = vector.multi_reduction <add>, %3, %cst_54 [1] : vector<8x32xf32> to vector<8xf32>
    %119 = vector.shape_cast %118 : vector<8xf32> to vector<8x1xf32>
    %cst_55 = arith.constant 3.200000e+01 : f32
    %120 = vector.broadcast %cst_55 : f32 to vector<8x1xf32>
    %121 = arith.divf %119, %120 : vector<8x1xf32>
    %122 = vector.broadcast %121 : vector<8x1xf32> to vector<8x32xf32>
    %123 = arith.subf %3, %122 : vector<8x32xf32>
    %124 = arith.mulf %123, %123 : vector<8x32xf32>
    %cst_56 = arith.constant dense<0.000000e+00> : vector<8xf32>
    %125 = vector.multi_reduction <add>, %124, %cst_56 [1] : vector<8x32xf32> to vector<8xf32>
    %126 = vector.shape_cast %125 : vector<8xf32> to vector<8x1xf32>
    %cst_57 = arith.constant 3.200000e+01 : f32
    %127 = vector.broadcast %cst_57 : f32 to vector<8x1xf32>
    %128 = arith.divf %126, %127 : vector<8x1xf32>
    %129 = vector.broadcast %121 : vector<8x1xf32> to vector<8x32xf32>
    %130 = arith.subf %3, %129 : vector<8x32xf32>
    %cst_58 = arith.constant 9.99999974E-6 : f32
    %131 = vector.broadcast %cst_58 : f32 to vector<8x1xf32>
    %132 = arith.addf %128, %131 : vector<8x1xf32>
    %133 = math.rsqrt %132 : vector<8x1xf32>
    %134 = vector.broadcast %133 : vector<8x1xf32> to vector<8x32xf32>
    %135 = arith.mulf %130, %134 : vector<8x32xf32>
    %136 = vector.broadcast %115 : vector<1x32xf32> to vector<8x32xf32>
    %137 = arith.mulf %135, %136 : vector<8x32xf32>
    %138 = vector.broadcast %117 : vector<1x32xf32> to vector<8x32xf32>
    %139 = arith.addf %137, %138 : vector<8x32xf32>
    %c1_59 = arith.constant 1 : index
    %c0_60 = arith.constant 0 : index
    %c0_61 = arith.constant 0 : index
    %140 = vector.load %arg5[%c1_59, %c0_60, %c0_61] : memref<3x32x96xf32, #tpu.memory_space<vmem>>, vector<1x32x96xf32>
    %141 = vector.shape_cast %140 : vector<1x32x96xf32> to vector<32x96xf32>
    %cst_62 = arith.constant dense<0.000000e+00> : vector<8x96xf32>
    %142 = tpu.matmul %139, %141, %cst_62 {dimension_numbers = #tpu.dot_dimension_numbers<[1], [0], [0], [1], [0, 0, 1, 1], [], []>} : vector<8x32xf32>, vector<32x96xf32>, vector<8x96xf32> -> vector<8x96xf32>
    %c1_63 = arith.constant 1 : index
    %c0_64 = arith.constant 0 : index
    %c0_65 = arith.constant 0 : index
    %143 = vector.load %arg6[%c1_63, %c0_64, %c0_65] : memref<3x1x96xf32, #tpu.memory_space<vmem>>, vector<1x1x96xf32>
    %144 = vector.shape_cast %143 : vector<1x1x96xf32> to vector<1x96xf32>
    %145 = vector.broadcast %144 : vector<1x96xf32> to vector<8x96xf32>
    %146 = arith.addf %142, %145 : vector<8x96xf32>
    %147 = vector.extract_strided_slice %146 {offsets = [0, 0], sizes = [8, 8], strides = [1, 1]} : vector<8x96xf32> to vector<8x8xf32>
    %148 = vector.extract_strided_slice %146 {offsets = [0, 32], sizes = [8, 8], strides = [1, 1]} : vector<8x96xf32> to vector<8x8xf32>
    %149 = vector.extract_strided_slice %146 {offsets = [0, 64], sizes = [8, 8], strides = [1, 1]} : vector<8x96xf32> to vector<8x8xf32>
    %cst_66 = arith.constant dense<0.000000e+00> : vector<8x8xf32>
    %150 = tpu.matmul %147, %148, %cst_66 {dimension_numbers = #tpu.dot_dimension_numbers<[1], [1], [0], [0], [0, 0, 1, 0], [], []>} : vector<8x8xf32>, vector<8x8xf32>, vector<8x8xf32> -> vector<8x8xf32>
    %cst_67 = arith.constant 0.353553385 : f32
    %151 = vector.broadcast %cst_67 : f32 to vector<8x8xf32>
    %152 = arith.mulf %150, %151 : vector<8x8xf32>
    %cst_68 = arith.constant dense<0xFF800000> : vector<8xf32>
    %153 = vector.multi_reduction <maximumf>, %152, %cst_68 [1] : vector<8x8xf32> to vector<8xf32>
    %154 = vector.shape_cast %153 : vector<8xf32> to vector<8x1xf32>
    %155 = vector.broadcast %154 : vector<8x1xf32> to vector<8x8xf32>
    %156 = arith.subf %152, %155 : vector<8x8xf32>
    %157 = math.exp %156 : vector<8x8xf32>
    %cst_69 = arith.constant dense<0.000000e+00> : vector<8xf32>
    %158 = vector.multi_reduction <add>, %157, %cst_69 [1] : vector<8x8xf32> to vector<8xf32>
    %159 = vector.shape_cast %158 : vector<8xf32> to vector<8x1xf32>
    %160 = tpu.reciprocal %159 : vector<8x1xf32> -> vector<8x1xf32>
    %161 = vector.broadcast %160 : vector<8x1xf32> to vector<8x8xf32>
    %162 = arith.mulf %157, %161 : vector<8x8xf32>
    %cst_70 = arith.constant dense<0.000000e+00> : vector<8x8xf32>
    %163 = tpu.matmul %162, %149, %cst_70 {dimension_numbers = #tpu.dot_dimension_numbers<[1], [0], [0], [1], [0, 0, 1, 1], [], []>} : vector<8x8xf32>, vector<8x8xf32>, vector<8x8xf32> -> vector<8x8xf32>
    %164 = vector.extract_strided_slice %146 {offsets = [0, 8], sizes = [8, 8], strides = [1, 1]} : vector<8x96xf32> to vector<8x8xf32>
    %165 = vector.extract_strided_slice %146 {offsets = [0, 40], sizes = [8, 8], strides = [1, 1]} : vector<8x96xf32> to vector<8x8xf32>
    %166 = vector.extract_strided_slice %146 {offsets = [0, 72], sizes = [8, 8], strides = [1, 1]} : vector<8x96xf32> to vector<8x8xf32>
    %cst_71 = arith.constant dense<0.000000e+00> : vector<8x8xf32>
    %167 = tpu.matmul %164, %165, %cst_71 {dimension_numbers = #tpu.dot_dimension_numbers<[1], [1], [0], [0], [0, 0, 1, 0], [], []>} : vector<8x8xf32>, vector<8x8xf32>, vector<8x8xf32> -> vector<8x8xf32>
    %cst_72 = arith.constant 0.353553385 : f32
    %168 = vector.broadcast %cst_72 : f32 to vector<8x8xf32>
    %169 = arith.mulf %167, %168 : vector<8x8xf32>
    %cst_73 = arith.constant dense<0xFF800000> : vector<8xf32>
    %170 = vector.multi_reduction <maximumf>, %169, %cst_73 [1] : vector<8x8xf32> to vector<8xf32>
    %171 = vector.shape_cast %170 : vector<8xf32> to vector<8x1xf32>
    %172 = vector.broadcast %171 : vector<8x1xf32> to vector<8x8xf32>
    %173 = arith.subf %169, %172 : vector<8x8xf32>
    %174 = math.exp %173 : vector<8x8xf32>
    %cst_74 = arith.constant dense<0.000000e+00> : vector<8xf32>
    %175 = vector.multi_reduction <add>, %174, %cst_74 [1] : vector<8x8xf32> to vector<8xf32>
    %176 = vector.shape_cast %175 : vector<8xf32> to vector<8x1xf32>
    %177 = tpu.reciprocal %176 : vector<8x1xf32> -> vector<8x1xf32>
    %178 = vector.broadcast %177 : vector<8x1xf32> to vector<8x8xf32>
    %179 = arith.mulf %174, %178 : vector<8x8xf32>
    %cst_75 = arith.constant dense<0.000000e+00> : vector<8x8xf32>
    %180 = tpu.matmul %179, %166, %cst_75 {dimension_numbers = #tpu.dot_dimension_numbers<[1], [0], [0], [1], [0, 0, 1, 1], [], []>} : vector<8x8xf32>, vector<8x8xf32>, vector<8x8xf32> -> vector<8x8xf32>
    %181 = vector.extract_strided_slice %146 {offsets = [0, 16], sizes = [8, 8], strides = [1, 1]} : vector<8x96xf32> to vector<8x8xf32>
    %182 = vector.extract_strided_slice %146 {offsets = [0, 48], sizes = [8, 8], strides = [1, 1]} : vector<8x96xf32> to vector<8x8xf32>
    %183 = vector.extract_strided_slice %146 {offsets = [0, 80], sizes = [8, 8], strides = [1, 1]} : vector<8x96xf32> to vector<8x8xf32>
    %cst_76 = arith.constant dense<0.000000e+00> : vector<8x8xf32>
    %184 = tpu.matmul %181, %182, %cst_76 {dimension_numbers = #tpu.dot_dimension_numbers<[1], [1], [0], [0], [0, 0, 1, 0], [], []>} : vector<8x8xf32>, vector<8x8xf32>, vector<8x8xf32> -> vector<8x8xf32>
    %cst_77 = arith.constant 0.353553385 : f32
    %185 = vector.broadcast %cst_77 : f32 to vector<8x8xf32>
    %186 = arith.mulf %184, %185 : vector<8x8xf32>
    %cst_78 = arith.constant dense<0xFF800000> : vector<8xf32>
    %187 = vector.multi_reduction <maximumf>, %186, %cst_78 [1] : vector<8x8xf32> to vector<8xf32>
    %188 = vector.shape_cast %187 : vector<8xf32> to vector<8x1xf32>
    %189 = vector.broadcast %188 : vector<8x1xf32> to vector<8x8xf32>
    %190 = arith.subf %186, %189 : vector<8x8xf32>
    %191 = math.exp %190 : vector<8x8xf32>
    %cst_79 = arith.constant dense<0.000000e+00> : vector<8xf32>
    %192 = vector.multi_reduction <add>, %191, %cst_79 [1] : vector<8x8xf32> to vector<8xf32>
    %193 = vector.shape_cast %192 : vector<8xf32> to vector<8x1xf32>
    %194 = tpu.reciprocal %193 : vector<8x1xf32> -> vector<8x1xf32>
    %195 = vector.broadcast %194 : vector<8x1xf32> to vector<8x8xf32>
    %196 = arith.mulf %191, %195 : vector<8x8xf32>
    %cst_80 = arith.constant dense<0.000000e+00> : vector<8x8xf32>
    %197 = tpu.matmul %196, %183, %cst_80 {dimension_numbers = #tpu.dot_dimension_numbers<[1], [0], [0], [1], [0, 0, 1, 1], [], []>} : vector<8x8xf32>, vector<8x8xf32>, vector<8x8xf32> -> vector<8x8xf32>
    %198 = vector.extract_strided_slice %146 {offsets = [0, 24], sizes = [8, 8], strides = [1, 1]} : vector<8x96xf32> to vector<8x8xf32>
    %199 = vector.extract_strided_slice %146 {offsets = [0, 56], sizes = [8, 8], strides = [1, 1]} : vector<8x96xf32> to vector<8x8xf32>
    %200 = vector.extract_strided_slice %146 {offsets = [0, 88], sizes = [8, 8], strides = [1, 1]} : vector<8x96xf32> to vector<8x8xf32>
    %cst_81 = arith.constant dense<0.000000e+00> : vector<8x8xf32>
    %201 = tpu.matmul %198, %199, %cst_81 {dimension_numbers = #tpu.dot_dimension_numbers<[1], [1], [0], [0], [0, 0, 1, 0], [], []>} : vector<8x8xf32>, vector<8x8xf32>, vector<8x8xf32> -> vector<8x8xf32>
    %cst_82 = arith.constant 0.353553385 : f32
    %202 = vector.broadcast %cst_82 : f32 to vector<8x8xf32>
    %203 = arith.mulf %201, %202 : vector<8x8xf32>
    %cst_83 = arith.constant dense<0xFF800000> : vector<8xf32>
    %204 = vector.multi_reduction <maximumf>, %203, %cst_83 [1] : vector<8x8xf32> to vector<8xf32>
    %205 = vector.shape_cast %204 : vector<8xf32> to vector<8x1xf32>
    %206 = vector.broadcast %205 : vector<8x1xf32> to vector<8x8xf32>
    %207 = arith.subf %203, %206 : vector<8x8xf32>
    %208 = math.exp %207 : vector<8x8xf32>
    %cst_84 = arith.constant dense<0.000000e+00> : vector<8xf32>
    %209 = vector.multi_reduction <add>, %208, %cst_84 [1] : vector<8x8xf32> to vector<8xf32>
    %210 = vector.shape_cast %209 : vector<8xf32> to vector<8x1xf32>
    %211 = tpu.reciprocal %210 : vector<8x1xf32> -> vector<8x1xf32>
    %212 = vector.broadcast %211 : vector<8x1xf32> to vector<8x8xf32>
    %213 = arith.mulf %208, %212 : vector<8x8xf32>
    %cst_85 = arith.constant dense<0.000000e+00> : vector<8x8xf32>
    %214 = tpu.matmul %213, %200, %cst_85 {dimension_numbers = #tpu.dot_dimension_numbers<[1], [0], [0], [1], [0, 0, 1, 1], [], []>} : vector<8x8xf32>, vector<8x8xf32>, vector<8x8xf32> -> vector<8x8xf32>
    %215 = tpu.concatenate %163, %180, %197, %214 in 1 : vector<8x8xf32>, vector<8x8xf32>, vector<8x8xf32>, vector<8x8xf32> -> vector<8x32xf32>
    %c1_86 = arith.constant 1 : index
    %c0_87 = arith.constant 0 : index
    %c0_88 = arith.constant 0 : index
    %216 = vector.load %arg7[%c1_86, %c0_87, %c0_88] : memref<3x32x32xf32, #tpu.memory_space<vmem>>, vector<1x32x32xf32>
    %217 = vector.shape_cast %216 : vector<1x32x32xf32> to vector<32x32xf32>
    %cst_89 = arith.constant dense<0.000000e+00> : vector<8x32xf32>
    %218 = tpu.matmul %215, %217, %cst_89 {dimension_numbers = #tpu.dot_dimension_numbers<[1], [0], [0], [1], [0, 0, 1, 1], [], []>} : vector<8x32xf32>, vector<32x32xf32>, vector<8x32xf32> -> vector<8x32xf32>
    %c1_90 = arith.constant 1 : index
    %c0_91 = arith.constant 0 : index
    %c0_92 = arith.constant 0 : index
    %219 = vector.load %arg8[%c1_90, %c0_91, %c0_92] : memref<3x1x32xf32, #tpu.memory_space<vmem>>, vector<1x1x32xf32>
    %220 = vector.shape_cast %219 : vector<1x1x32xf32> to vector<1x32xf32>
    %221 = vector.broadcast %220 : vector<1x32xf32> to vector<8x32xf32>
    %222 = arith.addf %218, %221 : vector<8x32xf32>
    %223 = arith.addf %3, %222 : vector<8x32xf32>
    %224 = tpu.concatenate %113, %223 in 0 : vector<8x32xf32>, vector<8x32xf32> -> vector<16x32xf32>
    %c2 = arith.constant 2 : index
    %c0_93 = arith.constant 0 : index
    %c0_94 = arith.constant 0 : index
    %225 = vector.load %arg3[%c2, %c0_93, %c0_94] : memref<5x1x32xf32, #tpu.memory_space<vmem>>, vector<1x1x32xf32>
    %226 = vector.shape_cast %225 : vector<1x1x32xf32> to vector<1x32xf32>
    %c2_95 = arith.constant 2 : index
    %c0_96 = arith.constant 0 : index
    %c0_97 = arith.constant 0 : index
    %227 = vector.load %arg4[%c2_95, %c0_96, %c0_97] : memref<5x1x32xf32, #tpu.memory_space<vmem>>, vector<1x1x32xf32>
    %228 = vector.shape_cast %227 : vector<1x1x32xf32> to vector<1x32xf32>
    %cst_98 = arith.constant dense<0.000000e+00> : vector<16xf32>
    %229 = vector.multi_reduction <add>, %224, %cst_98 [1] : vector<16x32xf32> to vector<16xf32>
    %230 = vector.shape_cast %229 : vector<16xf32> to vector<16x1xf32>
    %cst_99 = arith.constant 3.200000e+01 : f32
    %231 = vector.broadcast %cst_99 : f32 to vector<16x1xf32>
    %232 = arith.divf %230, %231 : vector<16x1xf32>
    %233 = vector.broadcast %232 : vector<16x1xf32> to vector<16x32xf32>
    %234 = arith.subf %224, %233 : vector<16x32xf32>
    %235 = arith.mulf %234, %234 : vector<16x32xf32>
    %cst_100 = arith.constant dense<0.000000e+00> : vector<16xf32>
    %236 = vector.multi_reduction <add>, %235, %cst_100 [1] : vector<16x32xf32> to vector<16xf32>
    %237 = vector.shape_cast %236 : vector<16xf32> to vector<16x1xf32>
    %cst_101 = arith.constant 3.200000e+01 : f32
    %238 = vector.broadcast %cst_101 : f32 to vector<16x1xf32>
    %239 = arith.divf %237, %238 : vector<16x1xf32>
    %240 = vector.broadcast %232 : vector<16x1xf32> to vector<16x32xf32>
    %241 = arith.subf %224, %240 : vector<16x32xf32>
    %cst_102 = arith.constant 9.99999974E-6 : f32
    %242 = vector.broadcast %cst_102 : f32 to vector<16x1xf32>
    %243 = arith.addf %239, %242 : vector<16x1xf32>
    %244 = math.rsqrt %243 : vector<16x1xf32>
    %245 = vector.broadcast %244 : vector<16x1xf32> to vector<16x32xf32>
    %246 = arith.mulf %241, %245 : vector<16x32xf32>
    %247 = vector.broadcast %226 : vector<1x32xf32> to vector<16x32xf32>
    %248 = arith.mulf %246, %247 : vector<16x32xf32>
    %249 = vector.broadcast %228 : vector<1x32xf32> to vector<16x32xf32>
    %250 = arith.addf %248, %249 : vector<16x32xf32>
    %c2_103 = arith.constant 2 : index
    %c0_104 = arith.constant 0 : index
    %c0_105 = arith.constant 0 : index
    %251 = vector.load %arg5[%c2_103, %c0_104, %c0_105] : memref<3x32x96xf32, #tpu.memory_space<vmem>>, vector<1x32x96xf32>
    %252 = vector.shape_cast %251 : vector<1x32x96xf32> to vector<32x96xf32>
    %cst_106 = arith.constant dense<0.000000e+00> : vector<16x96xf32>
    %253 = tpu.matmul %250, %252, %cst_106 {dimension_numbers = #tpu.dot_dimension_numbers<[1], [0], [0], [1], [0, 0, 1, 1], [], []>} : vector<16x32xf32>, vector<32x96xf32>, vector<16x96xf32> -> vector<16x96xf32>
    %c2_107 = arith.constant 2 : index
    %c0_108 = arith.constant 0 : index
    %c0_109 = arith.constant 0 : index
    %254 = vector.load %arg6[%c2_107, %c0_108, %c0_109] : memref<3x1x96xf32, #tpu.memory_space<vmem>>, vector<1x1x96xf32>
    %255 = vector.shape_cast %254 : vector<1x1x96xf32> to vector<1x96xf32>
    %256 = vector.broadcast %255 : vector<1x96xf32> to vector<16x96xf32>
    %257 = arith.addf %253, %256 : vector<16x96xf32>
    %258 = vector.extract_strided_slice %257 {offsets = [0, 0], sizes = [16, 8], strides = [1, 1]} : vector<16x96xf32> to vector<16x8xf32>
    %259 = vector.extract_strided_slice %257 {offsets = [0, 32], sizes = [16, 8], strides = [1, 1]} : vector<16x96xf32> to vector<16x8xf32>
    %260 = vector.extract_strided_slice %257 {offsets = [0, 64], sizes = [16, 8], strides = [1, 1]} : vector<16x96xf32> to vector<16x8xf32>
    %cst_110 = arith.constant dense<0.000000e+00> : vector<16x16xf32>
    %261 = tpu.matmul %258, %259, %cst_110 {dimension_numbers = #tpu.dot_dimension_numbers<[1], [1], [0], [0], [0, 0, 1, 0], [], []>} : vector<16x8xf32>, vector<16x8xf32>, vector<16x16xf32> -> vector<16x16xf32>
    %cst_111 = arith.constant 0.353553385 : f32
    %262 = vector.broadcast %cst_111 : f32 to vector<16x16xf32>
    %263 = arith.mulf %261, %262 : vector<16x16xf32>
    %cst_112 = arith.constant dense<0xFF800000> : vector<16xf32>
    %264 = vector.multi_reduction <maximumf>, %263, %cst_112 [1] : vector<16x16xf32> to vector<16xf32>
    %265 = vector.shape_cast %264 : vector<16xf32> to vector<16x1xf32>
    %266 = vector.broadcast %265 : vector<16x1xf32> to vector<16x16xf32>
    %267 = arith.subf %263, %266 : vector<16x16xf32>
    %268 = math.exp %267 : vector<16x16xf32>
    %cst_113 = arith.constant dense<0.000000e+00> : vector<16xf32>
    %269 = vector.multi_reduction <add>, %268, %cst_113 [1] : vector<16x16xf32> to vector<16xf32>
    %270 = vector.shape_cast %269 : vector<16xf32> to vector<16x1xf32>
    %271 = tpu.reciprocal %270 : vector<16x1xf32> -> vector<16x1xf32>
    %272 = vector.broadcast %271 : vector<16x1xf32> to vector<16x16xf32>
    %273 = arith.mulf %268, %272 : vector<16x16xf32>
    %cst_114 = arith.constant dense<0.000000e+00> : vector<16x8xf32>
    %274 = tpu.matmul %273, %260, %cst_114 {dimension_numbers = #tpu.dot_dimension_numbers<[1], [0], [0], [1], [0, 0, 1, 1], [], []>} : vector<16x16xf32>, vector<16x8xf32>, vector<16x8xf32> -> vector<16x8xf32>
    %275 = vector.extract_strided_slice %257 {offsets = [0, 8], sizes = [16, 8], strides = [1, 1]} : vector<16x96xf32> to vector<16x8xf32>
    %276 = vector.extract_strided_slice %257 {offsets = [0, 40], sizes = [16, 8], strides = [1, 1]} : vector<16x96xf32> to vector<16x8xf32>
    %277 = vector.extract_strided_slice %257 {offsets = [0, 72], sizes = [16, 8], strides = [1, 1]} : vector<16x96xf32> to vector<16x8xf32>
    %cst_115 = arith.constant dense<0.000000e+00> : vector<16x16xf32>
    %278 = tpu.matmul %275, %276, %cst_115 {dimension_numbers = #tpu.dot_dimension_numbers<[1], [1], [0], [0], [0, 0, 1, 0], [], []>} : vector<16x8xf32>, vector<16x8xf32>, vector<16x16xf32> -> vector<16x16xf32>
    %cst_116 = arith.constant 0.353553385 : f32
    %279 = vector.broadcast %cst_116 : f32 to vector<16x16xf32>
    %280 = arith.mulf %278, %279 : vector<16x16xf32>
    %cst_117 = arith.constant dense<0xFF800000> : vector<16xf32>
    %281 = vector.multi_reduction <maximumf>, %280, %cst_117 [1] : vector<16x16xf32> to vector<16xf32>
    %282 = vector.shape_cast %281 : vector<16xf32> to vector<16x1xf32>
    %283 = vector.broadcast %282 : vector<16x1xf32> to vector<16x16xf32>
    %284 = arith.subf %280, %283 : vector<16x16xf32>
    %285 = math.exp %284 : vector<16x16xf32>
    %cst_118 = arith.constant dense<0.000000e+00> : vector<16xf32>
    %286 = vector.multi_reduction <add>, %285, %cst_118 [1] : vector<16x16xf32> to vector<16xf32>
    %287 = vector.shape_cast %286 : vector<16xf32> to vector<16x1xf32>
    %288 = tpu.reciprocal %287 : vector<16x1xf32> -> vector<16x1xf32>
    %289 = vector.broadcast %288 : vector<16x1xf32> to vector<16x16xf32>
    %290 = arith.mulf %285, %289 : vector<16x16xf32>
    %cst_119 = arith.constant dense<0.000000e+00> : vector<16x8xf32>
    %291 = tpu.matmul %290, %277, %cst_119 {dimension_numbers = #tpu.dot_dimension_numbers<[1], [0], [0], [1], [0, 0, 1, 1], [], []>} : vector<16x16xf32>, vector<16x8xf32>, vector<16x8xf32> -> vector<16x8xf32>
    %292 = vector.extract_strided_slice %257 {offsets = [0, 16], sizes = [16, 8], strides = [1, 1]} : vector<16x96xf32> to vector<16x8xf32>
    %293 = vector.extract_strided_slice %257 {offsets = [0, 48], sizes = [16, 8], strides = [1, 1]} : vector<16x96xf32> to vector<16x8xf32>
    %294 = vector.extract_strided_slice %257 {offsets = [0, 80], sizes = [16, 8], strides = [1, 1]} : vector<16x96xf32> to vector<16x8xf32>
    %cst_120 = arith.constant dense<0.000000e+00> : vector<16x16xf32>
    %295 = tpu.matmul %292, %293, %cst_120 {dimension_numbers = #tpu.dot_dimension_numbers<[1], [1], [0], [0], [0, 0, 1, 0], [], []>} : vector<16x8xf32>, vector<16x8xf32>, vector<16x16xf32> -> vector<16x16xf32>
    %cst_121 = arith.constant 0.353553385 : f32
    %296 = vector.broadcast %cst_121 : f32 to vector<16x16xf32>
    %297 = arith.mulf %295, %296 : vector<16x16xf32>
    %cst_122 = arith.constant dense<0xFF800000> : vector<16xf32>
    %298 = vector.multi_reduction <maximumf>, %297, %cst_122 [1] : vector<16x16xf32> to vector<16xf32>
    %299 = vector.shape_cast %298 : vector<16xf32> to vector<16x1xf32>
    %300 = vector.broadcast %299 : vector<16x1xf32> to vector<16x16xf32>
    %301 = arith.subf %297, %300 : vector<16x16xf32>
    %302 = math.exp %301 : vector<16x16xf32>
    %cst_123 = arith.constant dense<0.000000e+00> : vector<16xf32>
    %303 = vector.multi_reduction <add>, %302, %cst_123 [1] : vector<16x16xf32> to vector<16xf32>
    %304 = vector.shape_cast %303 : vector<16xf32> to vector<16x1xf32>
    %305 = tpu.reciprocal %304 : vector<16x1xf32> -> vector<16x1xf32>
    %306 = vector.broadcast %305 : vector<16x1xf32> to vector<16x16xf32>
    %307 = arith.mulf %302, %306 : vector<16x16xf32>
    %cst_124 = arith.constant dense<0.000000e+00> : vector<16x8xf32>
    %308 = tpu.matmul %307, %294, %cst_124 {dimension_numbers = #tpu.dot_dimension_numbers<[1], [0], [0], [1], [0, 0, 1, 1], [], []>} : vector<16x16xf32>, vector<16x8xf32>, vector<16x8xf32> -> vector<16x8xf32>
    %309 = vector.extract_strided_slice %257 {offsets = [0, 24], sizes = [16, 8], strides = [1, 1]} : vector<16x96xf32> to vector<16x8xf32>
    %310 = vector.extract_strided_slice %257 {offsets = [0, 56], sizes = [16, 8], strides = [1, 1]} : vector<16x96xf32> to vector<16x8xf32>
    %311 = vector.extract_strided_slice %257 {offsets = [0, 88], sizes = [16, 8], strides = [1, 1]} : vector<16x96xf32> to vector<16x8xf32>
    %cst_125 = arith.constant dense<0.000000e+00> : vector<16x16xf32>
    %312 = tpu.matmul %309, %310, %cst_125 {dimension_numbers = #tpu.dot_dimension_numbers<[1], [1], [0], [0], [0, 0, 1, 0], [], []>} : vector<16x8xf32>, vector<16x8xf32>, vector<16x16xf32> -> vector<16x16xf32>
    %cst_126 = arith.constant 0.353553385 : f32
    %313 = vector.broadcast %cst_126 : f32 to vector<16x16xf32>
    %314 = arith.mulf %312, %313 : vector<16x16xf32>
    %cst_127 = arith.constant dense<0xFF800000> : vector<16xf32>
    %315 = vector.multi_reduction <maximumf>, %314, %cst_127 [1] : vector<16x16xf32> to vector<16xf32>
    %316 = vector.shape_cast %315 : vector<16xf32> to vector<16x1xf32>
    %317 = vector.broadcast %316 : vector<16x1xf32> to vector<16x16xf32>
    %318 = arith.subf %314, %317 : vector<16x16xf32>
    %319 = math.exp %318 : vector<16x16xf32>
    %cst_128 = arith.constant dense<0.000000e+00> : vector<16xf32>
    %320 = vector.multi_reduction <add>, %319, %cst_128 [1] : vector<16x16xf32> to vector<16xf32>
    %321 = vector.shape_cast %320 : vector<16xf32> to vector<16x1xf32>
    %322 = tpu.reciprocal %321 : vector<16x1xf32> -> vector<16x1xf32>
    %323 = vector.broadcast %322 : vector<16x1xf32> to vector<16x16xf32>
    %324 = arith.mulf %319, %323 : vector<16x16xf32>
    %cst_129 = arith.constant dense<0.000000e+00> : vector<16x8xf32>
    %325 = tpu.matmul %324, %311, %cst_129 {dimension_numbers = #tpu.dot_dimension_numbers<[1], [0], [0], [1], [0, 0, 1, 1], [], []>} : vector<16x16xf32>, vector<16x8xf32>, vector<16x8xf32> -> vector<16x8xf32>
    %326 = tpu.concatenate %274, %291, %308, %325 in 1 : vector<16x8xf32>, vector<16x8xf32>, vector<16x8xf32>, vector<16x8xf32> -> vector<16x32xf32>
    %c2_130 = arith.constant 2 : index
    %c0_131 = arith.constant 0 : index
    %c0_132 = arith.constant 0 : index
    %327 = vector.load %arg7[%c2_130, %c0_131, %c0_132] : memref<3x32x32xf32, #tpu.memory_space<vmem>>, vector<1x32x32xf32>
    %328 = vector.shape_cast %327 : vector<1x32x32xf32> to vector<32x32xf32>
    %cst_133 = arith.constant dense<0.000000e+00> : vector<16x32xf32>
    %329 = tpu.matmul %326, %328, %cst_133 {dimension_numbers = #tpu.dot_dimension_numbers<[1], [0], [0], [1], [0, 0, 1, 1], [], []>} : vector<16x32xf32>, vector<32x32xf32>, vector<16x32xf32> -> vector<16x32xf32>
    %c2_134 = arith.constant 2 : index
    %c0_135 = arith.constant 0 : index
    %c0_136 = arith.constant 0 : index
    %330 = vector.load %arg8[%c2_134, %c0_135, %c0_136] : memref<3x1x32xf32, #tpu.memory_space<vmem>>, vector<1x1x32xf32>
    %331 = vector.shape_cast %330 : vector<1x1x32xf32> to vector<1x32xf32>
    %332 = vector.broadcast %331 : vector<1x32xf32> to vector<16x32xf32>
    %333 = arith.addf %329, %332 : vector<16x32xf32>
    %334 = arith.addf %224, %333 : vector<16x32xf32>
    %335 = vector.extract_strided_slice %334 {offsets = [0, 0], sizes = [8, 32], strides = [1, 1]} : vector<16x32xf32> to vector<8x32xf32>
    %336 = vector.extract_strided_slice %334 {offsets = [8, 0], sizes = [8, 32], strides = [1, 1]} : vector<16x32xf32> to vector<8x32xf32>
    %c3 = arith.constant 3 : index
    %c0_137 = arith.constant 0 : index
    %c0_138 = arith.constant 0 : index
    %337 = vector.load %arg3[%c3, %c0_137, %c0_138] : memref<5x1x32xf32, #tpu.memory_space<vmem>>, vector<1x1x32xf32>
    %338 = vector.shape_cast %337 : vector<1x1x32xf32> to vector<1x32xf32>
    %c3_139 = arith.constant 3 : index
    %c0_140 = arith.constant 0 : index
    %c0_141 = arith.constant 0 : index
    %339 = vector.load %arg4[%c3_139, %c0_140, %c0_141] : memref<5x1x32xf32, #tpu.memory_space<vmem>>, vector<1x1x32xf32>
    %340 = vector.shape_cast %339 : vector<1x1x32xf32> to vector<1x32xf32>
    %cst_142 = arith.constant dense<0.000000e+00> : vector<8xf32>
    %341 = vector.multi_reduction <add>, %335, %cst_142 [1] : vector<8x32xf32> to vector<8xf32>
    %342 = vector.shape_cast %341 : vector<8xf32> to vector<8x1xf32>
    %cst_143 = arith.constant 3.200000e+01 : f32
    %343 = vector.broadcast %cst_143 : f32 to vector<8x1xf32>
    %344 = arith.divf %342, %343 : vector<8x1xf32>
    %345 = vector.broadcast %344 : vector<8x1xf32> to vector<8x32xf32>
    %346 = arith.subf %335, %345 : vector<8x32xf32>
    %347 = arith.mulf %346, %346 : vector<8x32xf32>
    %cst_144 = arith.constant dense<0.000000e+00> : vector<8xf32>
    %348 = vector.multi_reduction <add>, %347, %cst_144 [1] : vector<8x32xf32> to vector<8xf32>
    %349 = vector.shape_cast %348 : vector<8xf32> to vector<8x1xf32>
    %cst_145 = arith.constant 3.200000e+01 : f32
    %350 = vector.broadcast %cst_145 : f32 to vector<8x1xf32>
    %351 = arith.divf %349, %350 : vector<8x1xf32>
    %352 = vector.broadcast %344 : vector<8x1xf32> to vector<8x32xf32>
    %353 = arith.subf %335, %352 : vector<8x32xf32>
    %cst_146 = arith.constant 9.99999974E-6 : f32
    %354 = vector.broadcast %cst_146 : f32 to vector<8x1xf32>
    %355 = arith.addf %351, %354 : vector<8x1xf32>
    %356 = math.rsqrt %355 : vector<8x1xf32>
    %357 = vector.broadcast %356 : vector<8x1xf32> to vector<8x32xf32>
    %358 = arith.mulf %353, %357 : vector<8x32xf32>
    %359 = vector.broadcast %338 : vector<1x32xf32> to vector<8x32xf32>
    %360 = arith.mulf %358, %359 : vector<8x32xf32>
    %361 = vector.broadcast %340 : vector<1x32xf32> to vector<8x32xf32>
    %362 = arith.addf %360, %361 : vector<8x32xf32>
    %c0_147 = arith.constant 0 : index
    %c0_148 = arith.constant 0 : index
    %c0_149 = arith.constant 0 : index
    %363 = vector.load %arg9[%c0_147, %c0_148, %c0_149] : memref<2x32x64xf32, #tpu.memory_space<vmem>>, vector<1x32x64xf32>
    %364 = vector.shape_cast %363 : vector<1x32x64xf32> to vector<32x64xf32>
    %cst_150 = arith.constant dense<0.000000e+00> : vector<8x64xf32>
    %365 = tpu.matmul %362, %364, %cst_150 {dimension_numbers = #tpu.dot_dimension_numbers<[1], [0], [0], [1], [0, 0, 1, 1], [], []>} : vector<8x32xf32>, vector<32x64xf32>, vector<8x64xf32> -> vector<8x64xf32>
    %c0_151 = arith.constant 0 : index
    %c0_152 = arith.constant 0 : index
    %c0_153 = arith.constant 0 : index
    %366 = vector.load %arg10[%c0_151, %c0_152, %c0_153] : memref<2x1x64xf32, #tpu.memory_space<vmem>>, vector<1x1x64xf32>
    %367 = vector.shape_cast %366 : vector<1x1x64xf32> to vector<1x64xf32>
    %368 = vector.broadcast %367 : vector<1x64xf32> to vector<8x64xf32>
    %369 = arith.addf %365, %368 : vector<8x64xf32>
    %cst_154 = arith.constant 0.000000e+00 : f32
    %370 = vector.broadcast %cst_154 : f32 to vector<8x64xf32>
    %371 = arith.maximumf %369, %370 : vector<8x64xf32>
    %c0_155 = arith.constant 0 : index
    %c0_156 = arith.constant 0 : index
    %c0_157 = arith.constant 0 : index
    %372 = vector.load %arg11[%c0_155, %c0_156, %c0_157] : memref<2x64x32xf32, #tpu.memory_space<vmem>>, vector<1x64x32xf32>
    %373 = vector.shape_cast %372 : vector<1x64x32xf32> to vector<64x32xf32>
    %cst_158 = arith.constant dense<0.000000e+00> : vector<8x32xf32>
    %374 = tpu.matmul %371, %373, %cst_158 {dimension_numbers = #tpu.dot_dimension_numbers<[1], [0], [0], [1], [0, 0, 1, 1], [], []>} : vector<8x64xf32>, vector<64x32xf32>, vector<8x32xf32> -> vector<8x32xf32>
    %c0_159 = arith.constant 0 : index
    %c0_160 = arith.constant 0 : index
    %c0_161 = arith.constant 0 : index
    %375 = vector.load %arg12[%c0_159, %c0_160, %c0_161] : memref<2x1x32xf32, #tpu.memory_space<vmem>>, vector<1x1x32xf32>
    %376 = vector.shape_cast %375 : vector<1x1x32xf32> to vector<1x32xf32>
    %377 = vector.broadcast %376 : vector<1x32xf32> to vector<8x32xf32>
    %378 = arith.addf %374, %377 : vector<8x32xf32>
    %379 = arith.addf %335, %378 : vector<8x32xf32>
    %c4 = arith.constant 4 : index
    %c0_162 = arith.constant 0 : index
    %c0_163 = arith.constant 0 : index
    %380 = vector.load %arg3[%c4, %c0_162, %c0_163] : memref<5x1x32xf32, #tpu.memory_space<vmem>>, vector<1x1x32xf32>
    %381 = vector.shape_cast %380 : vector<1x1x32xf32> to vector<1x32xf32>
    %c4_164 = arith.constant 4 : index
    %c0_165 = arith.constant 0 : index
    %c0_166 = arith.constant 0 : index
    %382 = vector.load %arg4[%c4_164, %c0_165, %c0_166] : memref<5x1x32xf32, #tpu.memory_space<vmem>>, vector<1x1x32xf32>
    %383 = vector.shape_cast %382 : vector<1x1x32xf32> to vector<1x32xf32>
    %cst_167 = arith.constant dense<0.000000e+00> : vector<8xf32>
    %384 = vector.multi_reduction <add>, %336, %cst_167 [1] : vector<8x32xf32> to vector<8xf32>
    %385 = vector.shape_cast %384 : vector<8xf32> to vector<8x1xf32>
    %cst_168 = arith.constant 3.200000e+01 : f32
    %386 = vector.broadcast %cst_168 : f32 to vector<8x1xf32>
    %387 = arith.divf %385, %386 : vector<8x1xf32>
    %388 = vector.broadcast %387 : vector<8x1xf32> to vector<8x32xf32>
    %389 = arith.subf %336, %388 : vector<8x32xf32>
    %390 = arith.mulf %389, %389 : vector<8x32xf32>
    %cst_169 = arith.constant dense<0.000000e+00> : vector<8xf32>
    %391 = vector.multi_reduction <add>, %390, %cst_169 [1] : vector<8x32xf32> to vector<8xf32>
    %392 = vector.shape_cast %391 : vector<8xf32> to vector<8x1xf32>
    %cst_170 = arith.constant 3.200000e+01 : f32
    %393 = vector.broadcast %cst_170 : f32 to vector<8x1xf32>
    %394 = arith.divf %392, %393 : vector<8x1xf32>
    %395 = vector.broadcast %387 : vector<8x1xf32> to vector<8x32xf32>
    %396 = arith.subf %336, %395 : vector<8x32xf32>
    %cst_171 = arith.constant 9.99999974E-6 : f32
    %397 = vector.broadcast %cst_171 : f32 to vector<8x1xf32>
    %398 = arith.addf %394, %397 : vector<8x1xf32>
    %399 = math.rsqrt %398 : vector<8x1xf32>
    %400 = vector.broadcast %399 : vector<8x1xf32> to vector<8x32xf32>
    %401 = arith.mulf %396, %400 : vector<8x32xf32>
    %402 = vector.broadcast %381 : vector<1x32xf32> to vector<8x32xf32>
    %403 = arith.mulf %401, %402 : vector<8x32xf32>
    %404 = vector.broadcast %383 : vector<1x32xf32> to vector<8x32xf32>
    %405 = arith.addf %403, %404 : vector<8x32xf32>
    %c1_172 = arith.constant 1 : index
    %c0_173 = arith.constant 0 : index
    %c0_174 = arith.constant 0 : index
    %406 = vector.load %arg9[%c1_172, %c0_173, %c0_174] : memref<2x32x64xf32, #tpu.memory_space<vmem>>, vector<1x32x64xf32>
    %407 = vector.shape_cast %406 : vector<1x32x64xf32> to vector<32x64xf32>
    %cst_175 = arith.constant dense<0.000000e+00> : vector<8x64xf32>
    %408 = tpu.matmul %405, %407, %cst_175 {dimension_numbers = #tpu.dot_dimension_numbers<[1], [0], [0], [1], [0, 0, 1, 1], [], []>} : vector<8x32xf32>, vector<32x64xf32>, vector<8x64xf32> -> vector<8x64xf32>
    %c1_176 = arith.constant 1 : index
    %c0_177 = arith.constant 0 : index
    %c0_178 = arith.constant 0 : index
    %409 = vector.load %arg10[%c1_176, %c0_177, %c0_178] : memref<2x1x64xf32, #tpu.memory_space<vmem>>, vector<1x1x64xf32>
    %410 = vector.shape_cast %409 : vector<1x1x64xf32> to vector<1x64xf32>
    %411 = vector.broadcast %410 : vector<1x64xf32> to vector<8x64xf32>
    %412 = arith.addf %408, %411 : vector<8x64xf32>
    %cst_179 = arith.constant 0.000000e+00 : f32
    %413 = vector.broadcast %cst_179 : f32 to vector<8x64xf32>
    %414 = arith.maximumf %412, %413 : vector<8x64xf32>
    %c1_180 = arith.constant 1 : index
    %c0_181 = arith.constant 0 : index
    %c0_182 = arith.constant 0 : index
    %415 = vector.load %arg11[%c1_180, %c0_181, %c0_182] : memref<2x64x32xf32, #tpu.memory_space<vmem>>, vector<1x64x32xf32>
    %416 = vector.shape_cast %415 : vector<1x64x32xf32> to vector<64x32xf32>
    %cst_183 = arith.constant dense<0.000000e+00> : vector<8x32xf32>
    %417 = tpu.matmul %414, %416, %cst_183 {dimension_numbers = #tpu.dot_dimension_numbers<[1], [0], [0], [1], [0, 0, 1, 1], [], []>} : vector<8x64xf32>, vector<64x32xf32>, vector<8x32xf32> -> vector<8x32xf32>
    %c1_184 = arith.constant 1 : index
    %c0_185 = arith.constant 0 : index
    %c0_186 = arith.constant 0 : index
    %418 = vector.load %arg12[%c1_184, %c0_185, %c0_186] : memref<2x1x32xf32, #tpu.memory_space<vmem>>, vector<1x1x32xf32>
    %419 = vector.shape_cast %418 : vector<1x1x32xf32> to vector<1x32xf32>
    %420 = vector.broadcast %419 : vector<1x32xf32> to vector<8x32xf32>
    %421 = arith.addf %417, %420 : vector<8x32xf32>
    %422 = arith.addf %336, %421 : vector<8x32xf32>
    %c0_187 = arith.constant 0 : index
    %c0_188 = arith.constant 0 : index
    %c0_189 = arith.constant 0 : index
    %423 = vector.load %arg13[%c0_187, %c0_188, %c0_189] : memref<1x8x32xf32, #tpu.memory_space<vmem>>, vector<1x8x32xf32>
    %424 = vector.shape_cast %423 : vector<1x8x32xf32> to vector<8x32xf32>
    %425 = vector.shape_cast %379 : vector<8x32xf32> to vector<1x8x32xf32>
    tpu.vector_store %arg13[%c0_187, %c0_188, %c0_189], %425 {strides = array<i32>} : memref<1x8x32xf32, #tpu.memory_space<vmem>>, vector<1x8x32xf32>,
    %c0_190 = arith.constant 0 : index
    %c0_191 = arith.constant 0 : index
    %c0_192 = arith.constant 0 : index
    %426 = vector.load %arg14[%c0_190, %c0_191, %c0_192] : memref<1x8x32xf32, #tpu.memory_space<vmem>>, vector<1x8x32xf32>
    %427 = vector.shape_cast %426 : vector<1x8x32xf32> to vector<8x32xf32>
    %428 = vector.shape_cast %422 : vector<8x32xf32> to vector<1x8x32xf32>
    tpu.vector_store %arg14[%c0_190, %c0_191, %c0_192], %428 {strides = array<i32>} : memref<1x8x32xf32, #tpu.memory_space<vmem>>, vector<1x8x32xf32>,
    return
  }
  func.func @transform_0(%arg0: i32) -> (i32, i32, i32) {
    %c0_i32 = arith.constant 0 : i32
    %c0_i32_0 = arith.constant 0 : i32
    %c0_i32_1 = arith.constant 0 : i32
    return %arg0, %c0_i32, %c0_i32_0 : i32, i32, i32
  }
  func.func @transform_1(%arg0: i32) -> (i32, i32, i32) {
    %c0_i32 = arith.constant 0 : i32
    %c0_i32_0 = arith.constant 0 : i32
    %c0_i32_1 = arith.constant 0 : i32
    return %arg0, %c0_i32, %c0_i32_0 : i32, i32, i32
  }
  func.func @transform_2(%arg0: i32) -> (i32, i32, i32) {
    %c0_i32 = arith.constant 0 : i32
    %c0_i32_0 = arith.constant 0 : i32
    %c0_i32_1 = arith.constant 0 : i32
    %c0_i32_2 = arith.constant 0 : i32
    return %c0_i32, %c0_i32_0, %c0_i32_1 : i32, i32, i32
  }
  func.func @transform_3(%arg0: i32) -> (i32, i32, i32) {
    %c0_i32 = arith.constant 0 : i32
    %c0_i32_0 = arith.constant 0 : i32
    %c0_i32_1 = arith.constant 0 : i32
    %c0_i32_2 = arith.constant 0 : i32
    return %c0_i32, %c0_i32_0, %c0_i32_1 : i32, i32, i32
  }
  func.func @transform_4(%arg0: i32) -> (i32, i32, i32) {
    %c0_i32 = arith.constant 0 : i32
    %c0_i32_0 = arith.constant 0 : i32
    %c0_i32_1 = arith.constant 0 : i32
    %c0_i32_2 = arith.constant 0 : i32
    return %c0_i32, %c0_i32_0, %c0_i32_1 : i32, i32, i32
  }
  func.func @transform_5(%arg0: i32) -> (i32, i32, i32) {
    %c0_i32 = arith.constant 0 : i32
    %c0_i32_0 = arith.constant 0 : i32
    %c0_i32_1 = arith.constant 0 : i32
    %c0_i32_2 = arith.constant 0 : i32
    return %c0_i32, %c0_i32_0, %c0_i32_1 : i32, i32, i32
  }
  func.func @transform_6(%arg0: i32) -> (i32, i32, i32) {
    %c0_i32 = arith.constant 0 : i32
    %c0_i32_0 = arith.constant 0 : i32
    %c0_i32_1 = arith.constant 0 : i32
    %c0_i32_2 = arith.constant 0 : i32
    return %c0_i32, %c0_i32_0, %c0_i32_1 : i32, i32, i32
  }
  func.func @transform_7(%arg0: i32) -> (i32, i32, i32) {
    %c0_i32 = arith.constant 0 : i32
    %c0_i32_0 = arith.constant 0 : i32
    %c0_i32_1 = arith.constant 0 : i32
    %c0_i32_2 = arith.constant 0 : i32
    return %c0_i32, %c0_i32_0, %c0_i32_1 : i32, i32, i32
  }
  func.func @transform_8(%arg0: i32) -> (i32, i32, i32) {
    %c0_i32 = arith.constant 0 : i32
    %c0_i32_0 = arith.constant 0 : i32
    %c0_i32_1 = arith.constant 0 : i32
    %c0_i32_2 = arith.constant 0 : i32
    return %c0_i32, %c0_i32_0, %c0_i32_1 : i32, i32, i32
  }
  func.func @transform_9(%arg0: i32) -> (i32, i32, i32) {
    %c0_i32 = arith.constant 0 : i32
    %c0_i32_0 = arith.constant 0 : i32
    %c0_i32_1 = arith.constant 0 : i32
    %c0_i32_2 = arith.constant 0 : i32
    return %c0_i32, %c0_i32_0, %c0_i32_1 : i32, i32, i32
  }
  func.func @transform_10(%arg0: i32) -> (i32, i32, i32) {
    %c0_i32 = arith.constant 0 : i32
    %c0_i32_0 = arith.constant 0 : i32
    %c0_i32_1 = arith.constant 0 : i32
    %c0_i32_2 = arith.constant 0 : i32
    return %c0_i32, %c0_i32_0, %c0_i32_1 : i32, i32, i32
  }
  func.func @transform_11(%arg0: i32) -> (i32, i32, i32) {
    %c0_i32 = arith.constant 0 : i32
    %c0_i32_0 = arith.constant 0 : i32
    %c0_i32_1 = arith.constant 0 : i32
    %c0_i32_2 = arith.constant 0 : i32
    return %c0_i32, %c0_i32_0, %c0_i32_1 : i32, i32, i32
  }
  func.func @transform_12(%arg0: i32) -> (i32, i32, i32) {
    %c0_i32 = arith.constant 0 : i32
    %c0_i32_0 = arith.constant 0 : i32
    %c0_i32_1 = arith.constant 0 : i32
    return %arg0, %c0_i32, %c0_i32_0 : i32, i32, i32
  }
  func.func @transform_13(%arg0: i32) -> (i32, i32, i32) {
    %c0_i32 = arith.constant 0 : i32
    %c0_i32_0 = arith.constant 0 : i32
    %c0_i32_1 = arith.constant 0 : i32
    return %arg0, %c0_i32, %c0_i32_0 : i32, i32, i32
  }
}

</mosaic_0001>

<bundles_post_ra>
// kernel: cross_attention_layer.1
= control target key start
LH: loop header
LB: loop body
LE: loop exit
PB: predicated region body
PF: predicated region fallthrough
CT: control target
= control target key end

     0   :  { %19 = vsyncpa [#allocation3], 0  ;;  %s5482_s0 = inlined_call_operand.vmem [shape: f32[2,8,32], index: 0, kind: input, shape index: {}]   ;;  %s5483_s1 = inlined_call_operand.vmem [shape: f32[2,8,32], index: 1, kind: input, shape index: {}]   ;;  %s5484_s2 = inlined_call_operand.vmem [shape: f32[5,1,32], index: 2, kind: input, shape index: {}]   ;;  %s5485_s3 = inlined_call_operand.vmem [shape: f32[5,1,32], index: 3, kind: input, shape index: {}]   ;;  %s5486_s4 = inlined_call_operand.vmem [shape: f32[3,32,96], index: 4, kind: input, shape index: {}]   ;;  %s5487_s5 = inlined_call_operand.hbm [shape: f32[3,1,96], index: 5, kind: input, shape index: {}]   ;;  %s5488_s6 = inlined_call_operand.vmem [shape: f32[3,32,32], index: 6, kind: input, shape index: {}]   ;;  %s5489_s7 = inlined_call_operand.hbm [shape: f32[3,1,32], index: 7, kind: input, shape index: {}]   ;;  %s5490_s8 = inlined_call_operand.vmem [shape: f32[2,32,64], index: 8, kind: input, shape index: {}]   ;;  %s5491_s9 = inlined_call_operand.hbm [shape: f32[2,1,64], index: 9, kind: input, shape index: {}]   ;;  %s5492_s10 = inlined_call_operand.vmem [shape: f32[2,64,32], index: 10, kind: input, shape index: {}]   ;;  %s5493_s11 = inlined_call_operand.hbm [shape: f32[2,1,32], index: 11, kind: input, shape index: {}]   ;;  %s5494_s12 = inlined_call_operand.vmem [shape: f32[2,8,32], index: 12, kind: output, shape index: {0}]   ;;  %s5495_s13 = inlined_call_operand.vmem [shape: f32[2,8,32], index: 13, kind: output, shape index: {1}]  }
   0x1   :  { %20 = vsyncpa [#allocation5], 0 }
   0x2   :  { %21 = vsyncpa [#allocation8], 0  ;;  %s4794_s25 = smov 0  }
   0x3 LB: > { %s4800_s26 = sadd.s32 4294967295, %s4700_s25   ;;  %p3916_p0 = scmp.ge.s32.totalorder %s4700_s25, 1  ;;  %s4700_s25 = sphi %s4794_s25, %s27_s25  }
   0x4   : > { %p346_p1 = scmp.lt.s32.totalorder %s4700_s25, 3  ;;  %p4464_p2 = scmp.eq.s32.totalorder %s4800_s26, 0 }
   0x5   : > { %s4702_s28 = smov [#allocation4]   ;;  %s4703_s30 = smov [#allocation2]  }
   0x6   : > { %p4805_p3 = pnand %p3916_p0, %p346_p1  ;;  %s383_s29 = sshll.u32 %s4702_s28, 4  ;;  %s384_s29 = int_to_ptr.vmem [resolvable:$true] %s383_s29 }
   0x7   : > { %s367_s14 = sshll.u32 %s4703_s30, 4  ;;  %s4704_s16 = smov [#allocation6]   ;;  %s4811_s14 = int_to_ptr.vmem [resolvable:$true] %s367_s14 }
   0x8   : > { %p4451_p4 = pneg %p4805_p3  ;;  %s399_s17 = sshll.u32 %s4704_s16, 4  ;;  %s4819_s17 = int_to_ptr.vmem [resolvable:$true] %s399_s17 }
   0x9   : > { %s4705_s18 = smov [#allocation7]   ;;  %s4589_s20 = scalar_lea.vmem %s384_s29, 48 }
   0xa   : > { %p4815_p5 = pnand %p4464_p2, %p4451_p4  ;;  %s4821_s19 = sshll.u32 %s4705_s18, 4  ;;  %s416_s19 = int_to_ptr.vmem [resolvable:$true] %s4821_s19 }
   0xb   : > { %p4590_p7 = scmp.ne.s32.totalorder %s384_s29, %s4589_s20  ;;  %s4596_s21 = scalar_lea.vmem %s384_s29, 64 }
   0xc   : > { %p4580_p6 = pneg %p4815_p5  ;;  %p4597_p10 = scmp.lt.s32.totalorder %s384_s29, %s384_s29 }
   0xd   : > { %p4598_p11 = scmp.lt.s32.totalorder %s4596_s21, %s4589_s20 }
   0xe   : > { %p4592_p8 = pnand %p4590_p7, %p4580_p6 }
   0xf   : > { %p4599_p12 = por %p4598_p11, %p4597_p10 }
  0x10   : > { %p4593_p9 = pneg %p4592_p8 }
  0x12   : > { %p4600_p13 = pnand %p4599_p12, %p4593_p9 }
  0x14   : > { %4603 = shalt.err (!%p4600_p13)
}
  0x15   : > { %s4706_s22 = smov 16   ;;  %s4707_s23 = smov 1  }
  0x16   : > { %4457 = dma.hbm_to_vmem [thread:$0]  (!%p4815_p5), %s5489_s7, 48, %s384_s29, [#allocation5], %s4706_s22, %s4706_s22, %s4707_s23  }
  0x17   : > { %s4615_s30 = scalar_lea.vmem %s4811_s14, 48  ;;  %s4622_s16 = scalar_lea.vmem %s4811_s14, 64 }
  0x18   : > { %p4616_p0 = scmp.ne.s32.totalorder %s4811_s14, %s4615_s30  ;;  %p4623_p7 = scmp.lt.s32.totalorder %s4811_s14, %s4811_s14 }
  0x19   : > { %p4624_p8 = scmp.lt.s32.totalorder %s4622_s16, %s4615_s30 }
  0x1a   : > { %p4618_p1 = pnand %p4616_p0, %p4580_p6 }
  0x1b   : > { %p4625_p9 = por %p4624_p8, %p4623_p7 }
  0x1c   : > { %p4619_p4 = pneg %p4618_p1 }
  0x1e   : > { %p4626_p10 = pnand %p4625_p9, %p4619_p4 }
  0x20   : > { %4629 = shalt.err (!%p4626_p10)
}
  0x21   : > { %4454 = dma.hbm_to_vmem [thread:$0]  (!%p4815_p5), %s5487_s5, 48, %s4811_s14, [#allocation3], %s4706_s22, %s4706_s22, %s4707_s23  }
  0x22   : > { %s4641_s20 = scalar_lea.vmem %s4819_s17, 32  ;;  %p4649_p0 = scmp.lt.s32.totalorder %s4819_s17, %s4819_s17 }
  0x23   : > { %p4642_p11 = scmp.ne.s32.totalorder %s4819_s17, %s4641_s20  ;;  %p4650_p1 = scmp.lt.s32.totalorder %s4641_s20, %s4641_s20 }
  0x25   : > { %p4644_p12 = pnand %p4642_p11, %p4580_p6  ;;  %p4651_p4 = por %p4650_p1, %p4649_p0 }
  0x27   : > { %p4645_p13 = pneg %p4644_p12 }
  0x29   : > { %p4652_p7 = pnand %p4651_p4, %p4645_p13 }
  0x2b   : > { %4655 = shalt.err (!%p4652_p7)
}
  0x2c   : > { %4460 = dma.hbm_to_vmem [thread:$0]  (!%p4815_p5), %s5491_s9, 32, %s4819_s17, [#allocation5], %s4706_s22, %s4706_s22, %s4707_s23  }
  0x2d   : > { %s4667_s24 = scalar_lea.vmem %s416_s19, 32  ;;  %p4675_p11 = scmp.lt.s32.totalorder %s416_s19, %s416_s19 }
  0x2e   : > { %p4668_p8 = scmp.ne.s32.totalorder %s416_s19, %s4667_s24  ;;  %p4676_p12 = scmp.lt.s32.totalorder %s4667_s24, %s4667_s24 }
  0x30   : > { %p4670_p9 = pnand %p4668_p8, %p4580_p6  ;;  %p4677_p13 = por %p4676_p12, %p4675_p11 }
  0x32   : > { %p4671_p10 = pneg %p4670_p9 }
  0x34   : > { %p4678_p0 = pnand %p4677_p13, %p4671_p10 }
  0x36   : > { %4681 = shalt.err (!%p4678_p0)
}
  0x37   : > { %4463 = dma.hbm_to_vmem [thread:$0]  (!%p4815_p5), %s5493_s11, 32, %s416_s19, [#allocation8], %s4706_s22, %s4706_s22, %s4707_s23  }
  0x38   : > { %445 = sbr.rel (%p4805_p3) target bundleno = 6520 (0x1978), region = 68 }
  0x3d   : > { %4687 = dma.done.wait (%p4464_p2), [#allocation3], 48  }
  0x3e   : > { %4689 = vsyncadd (%p4464_p2), [#allocation3], 4294967248 }
  0x3f   : > { %4691 = dma.done.wait (%p4464_p2), [#allocation5], 80  }
  0x40   : > { %4693 = vsyncadd (%p4464_p2), [#allocation5], 4294967216 }
  0x41   : > { %4695 = dma.done.wait (%p4464_p2), [#allocation8], 32  }
  0x42   : > { %4697 = vsyncadd (%p4464_p2), [#allocation8], 4294967264  ;;  %p507_p3 = scmp.lt.s32.totalorder %s4800_s26, 1  ;;  %vm527_vm0 = vcmask 261120   ;;  %v559_v7 = vld [vmem:[%s5486_s4 + $0x18] sm:$0xff]  ;;  %v4708_v8 = vmov 0.0  }
  0x43   : > { %4173 = vmatprep.subr.mxu0 %v4708_v8  ;;  %v558_v9 = vld [vmem:[%s5486_s4 + $0x10] sm:$0xff]  ;;  %vm4709_vm1 = vmmov 0   ;;  %4189 = vmatprep.subr.mxu1 %v4708_v8  ;;  %v557_v10 = vld [vmem:[%s5486_s4 + $0x8] sm:$0xff]  ;;  %v556_v11 = vld [vmem:[%s5486_s4] sm:$0xff]  ;;  %s5512_s15 = smov 120   ;;  %s4711_s17 = smov 96  }
  0x44   : > { %s5532_s26 = smov (!%p507_p3, %s4800_s26), 1  ;;  %4181 = vmatprep.mubr.msk.f32.mxu0 %vm4709_vm1, %v4708_v8  ;;  %4174 = vmatpush3.msra.mxu0 %v559_v7  ;;  %v3931_v16 = vld [vmem:[%s5484_s2] ss:$0 sm:$0xff]  ;;  %s5508_s22 = smov 112   ;;  %vm643_vm2 = vcmask 64512   ;;  %vm1317_vm3 = vcmask 130048  }
  0x45   : > { %s4897_s27 = sshll.u32 %s5532_s26, 3  ;;  %4175 = vmatprep.subr.mxu0 %v4708_v8  ;;  %4191 = vmatprep.mubr.msk.f32.mxu1 %vm4709_vm1, %v4708_v8  ;;  %v3932_v18 = vld [vmem:[%s5485_s3] ss:$0 sm:$0xff]  ;;  %s5510_s26 = smov 80   ;;  %vm1319_vm4 = vcmask 195584   ;;  %vm3491_vm5 = vcmask 523264  }
  0x46   : > { %s510_s19 = scalar_lea.vmem %s5482_s0, %s4897_s27  ;;  %4176 = vmatpush3.msra.mxu0 %v558_v9  ;;  %v3933_v21 = vld [vmem:[#allocation2] ss:$0 sm:$0xff]  ;;  %s5506_s23 = smov 72  }
  0x47   : > { %v4903_v0 = vld [vmem:[%s510_s19] sm:$0xff]  ;;  %4177 = vmatprep.subr.mxu0 %v4708_v8  ;;  %s4712_s19 = smov 88   ;;  %s5504_s16 = smov 104  }
  0x48   : > { %v528_v1 = vsel %vm527_vm0, %v4903_v0, 0.0  ;;  %4178 = vmatpush3.msra.mxu0 %v557_v10  ;;  %s514_s20 = scalar_lea.vmem %s5483_s1, %s4897_s27  ;;  %s5502_s21 = smov 64  }
  0x49   : > { %529 = vadd.xlane.f32.xlu0 %v528_v1  ;;  %4179 = vmatprep.subr.mxu0 %v4708_v8  ;;  %v4983_v43 = vld [vmem:[%s514_s20] sm:$0xff]  ;;  %s5496_s14 = smov 56   ;;  %s5500_s24 = smov 48  }
  0x4a   : > { %4180 = vmatpush3.msra.mxu0 %v556_v11  ;;  %v1410_v45 = vsel %vm527_vm0, %v4983_v43, 0.0  ;;  %s5498_s28 = smov 40   ;;  %s5514_s18 = smov 24  }
  0x4b   : > { %4184 = vmatprep.subr.mxu0 %v4708_v8  ;;  %s5520_s20 = smov 64   ;;  %s5521_s30 = smov 48  }
  0x4c   : > { %s5522_s29 = smov 40  }
  0xd2   : > { %v530_v2 = vpop.xlane.xlu0 %529 }
  0xd3   : > { %v532_v3 = vmul.f32 0.03125, %v530_v2 }
  0xd5   : > { %v533_v4 = vsub.f32 %v4903_v0, %v532_v3 }
  0xd7   : > { %v534_v5 = vmul.f32 %v533_v4, %v533_v4 }
  0xd9   : > { %v535_v6 = vsel %vm527_vm0, %v534_v5, 0.0 }
  0xda   : > { %536 = vadd.xlane.f32.xlu0 %v535_v6 }
 0x163   : > { %v537_v12 = vpop.xlane.xlu0 %536 }
 0x164   : > { %v538_v13 = vmul.f32 0.03125, %v537_v12 }
 0x166   : > { %v539_v14 = vadd.f32 1e-05, %v538_v13 }
 0x168   : > { %4502 = vrsqrt.f32 %v539_v14 }
 0x175   : > { %v4503_v15 = vpop.eup %4502 }
 0x176   : > { %v541_v17 = vmul.f32 %v4503_v15, %v533_v4 }
 0x178   : > { %v548_v19 = vmul.f32 %v3931_v16, %v541_v17 }
 0x17a   : > { %v555_v20 = vadd.f32 %v3932_v18, %v548_v19 }
 0x17c   : > { %4182 = vmatmul.mubr.msk.f32.vlgmr.msra.gmra.mxu0 %vm527_vm0, %v555_v20 }
 0x17d   : > { %4186 = vmatprep.mubr.msk.f32.mxu0 %vm4709_vm1, %v4708_v8 }
 0x23c   : > { %v636_v22 = vpop.f32.mrf.mxu0 }
 0x23d   : > { %v4940_v23 = vadd.f32 %v3933_v21, %v636_v22 }
 0x23e   : > { %v4183_v24 = vpop.f32.mrf.mxu0 }
 0x23f   : > { %806 = vrot.lane.b32.xlu0 %v4940_v23, %s5512_s15  ;;  %641 = vrot.lane.b32.xlu1 %v4940_v23, %s4711_s17 }
 0x243   : > { %808 = vrot.lane.b32.xlu1 %v4940_v23, %s4712_s19 }
 0x247   : > { %974 = vrot.lane.b32.xlu1 %v4940_v23, %s5510_s26 }
 0x24b   : > { %972 = vrot.lane.b32.xlu1 %v4940_v23, %s5508_s22 }
 0x24f   : > { %1140 = vrot.lane.b32.xlu1 %v4940_v23, %s5506_s23 }
 0x253   : > { %1138 = vrot.lane.b32.xlu1 %v4940_v23, %s5504_s16 }
 0x2b1   : > { %v642_v25 = vpop.permute.xlu1 %641  ;;  %v807_v27 = vpop.permute.xlu0 %806 }
 0x2b2   : > { %4185 = vmatpush3.xpose.msk.msra.mxu0 %vm643_vm2, %v642_v25 }
 0x2b3   : > { %4194 = vmatprep.subr.mxu0 %v4708_v8 }
 0x2b5   : > { %4187 = vmatmul.mubr.msk.f32.vlgmr.msra.gmra.mxu0 %vm643_vm2, %v4940_v23  ;;  %v809_v26 = vpop.permute.xlu1 %808 }
 0x2b6   : > { %4195 = vmatpush3.xpose.msk.msra.mxu0 %vm643_vm2, %v809_v26  ;;  %4196 = vmatprep.mubr.msk.f32.mxu0 %vm4709_vm1, %v4708_v8 }
 0x2b7   : > { %4204 = vmatprep.subr.mxu0 %v4708_v8 }
 0x2b9   : > { %4197 = vmatmul.mubr.msk.f32.vlgmr.msra.gmra.mxu0 %vm643_vm2, %v807_v27  ;;  %v975_v28 = vpop.permute.xlu1 %974 }
 0x2ba   : > { %4205 = vmatpush3.xpose.msk.msra.mxu0 %vm643_vm2, %v975_v28  ;;  %4206 = vmatprep.mubr.msk.f32.mxu0 %vm4709_vm1, %v4708_v8 }
 0x2bb   : > { %4214 = vmatprep.subr.mxu0 %v4708_v8 }
 0x2bd   : > { %v973_v29 = vpop.permute.xlu1 %972 }
 0x2be   : > { %4207 = vmatmul.mubr.msk.f32.vlgmr.msra.gmra.mxu0 %vm643_vm2, %v973_v29 }
 0x2bf   : > { %4216 = vmatprep.mubr.msk.f32.mxu0 %vm4709_vm1, %v4708_v8 }
 0x2c1   : > { %v1141_v30 = vpop.permute.xlu1 %1140 }
 0x2c2   : > { %4215 = vmatpush3.xpose.msk.msra.mxu0 %vm643_vm2, %v1141_v30 }
 0x2c3   : > { %4224 = vmatprep.subr.mxu0 %v4708_v8 }
 0x2c5   : > { %v1139_v31 = vpop.permute.xlu1 %1138 }
 0x2c6   : > { %4217 = vmatmul.mubr.msk.f32.vlgmr.msra.gmra.mxu0 %vm643_vm2, %v1139_v31 }
 0x2c7   : > { %4232 = vmatprep.mubr.msk.f32.mxu0 %vm4709_vm1, %v4708_v8 }
 0x375   : > { %v714_v32 = vpop.f32.mrf.mxu0 }
 0x376   : > { %v718_v33 = vmul.f32 0.35355338, %v714_v32 }
 0x377   : > { %v4188_v34 = vpop.f32.mrf.mxu0 }
 0x378   : > { %v719_v35 = vsel %vm643_vm2, %v718_v33, -inf  ;;  %v3956_v34 = vld [vmem:[%s5486_s4 + $0x38] sm:$0xff] }
 0x379   : > { %720 = vmax.xlane.f32.xlu1 %v719_v35  ;;  %v880_v36 = vpop.f32.mrf.mxu0  ;;  %v3951_v35 = vld [vmem:[%s5484_s2 + $0x1] ss:$0 sm:$0xff] }
 0x37a   : > { %v884_v37 = vmul.f32 0.35355338, %v880_v36  ;;  %v3955_v36 = vld [vmem:[%s5486_s4 + $0x30] sm:$0xff] }
 0x37b   : > { %v4198_v38 = vpop.f32.mrf.mxu0 }
 0x37c   : > { %v885_v39 = vsel %vm643_vm2, %v884_v37, -inf }
 0x37d   : > { %886 = vmax.xlane.f32.xlu0 %v885_v39  ;;  %v3952_v39 = vld [vmem:[%s5485_s3 + $0x1] ss:$0 sm:$0xff] }
 0x37e   : > { %v1046_v40 = vpop.f32.mrf.mxu0 }
 0x37f   : > { %v1050_v41 = vmul.f32 0.35355338, %v1046_v40  ;;  %v3953_v40 = vld [vmem:[%s5486_s4 + $0x20] sm:$0xff] }
 0x380   : > { %v4208_v42 = vpop.f32.mrf.mxu0 }
 0x381   : > { %v1051_v44 = vsel %vm643_vm2, %v1050_v41, -inf }
 0x382   : > { %1052 = vmax.xlane.f32.xlu1 %v1051_v44 }
 0x386   : > { %1411 = vadd.xlane.f32.xlu1 %v1410_v45  ;;  %v1212_v46 = vpop.f32.mrf.mxu0  ;;  %v1324_v45 = vld [vmem:[%s5488_s6 + $0x18] sm:$0xff] }
 0x387   : > { %v1216_v47 = vmul.f32 0.35355338, %v1212_v46  ;;  %4225 = vmatpush3.msra.mxu0 %v1324_v45  ;;  %v1323_v46 = vld [vmem:[%s5488_s6 + $0x10] sm:$0xff] }
 0x388   : > { %v4218_v48 = vpop.f32.mrf.mxu0  ;;  %4226 = vmatprep.subr.mxu0 %v4708_v8 }
 0x389   : > { %v1217_v49 = vsel %vm643_vm2, %v1216_v47, -inf  ;;  %4227 = vmatpush3.msra.mxu0 %v1323_v46  ;;  %v1321_v48 = vld [vmem:[%s5488_s6] sm:$0xff] }
 0x38a   : > { %1218 = vmax.xlane.f32.xlu0 %v1217_v49  ;;  %4228 = vmatprep.subr.mxu0 %v4708_v8 }
 0x402   : > { %v721_v50 = vpop.xlane.xlu1 %720 }
 0x403   : > { %v722_v51 = vsub.f32 %v718_v33, %v721_v50 }
 0x405   : > { %v723_v52 = vmul.f32 1.442695, %v722_v51 }
 0x406   : > { %v887_v56 = vpop.xlane.xlu0 %886 }
 0x407   : > { %4504 = vpow2.f32 %v723_v52  ;;  %v888_v9 = vsub.f32 %v884_v37, %v887_v56  ;;  %v3954_v37 = vld [vmem:[%s5486_s4 + $0x28] sm:$0xff] }
 0x409   : > { %v889_v10 = vmul.f32 1.442695, %v888_v9 }
 0x40b   : > { %v1053_v53 = vpop.xlane.xlu1 %1052 }
 0x40c   : > { %v1054_v54 = vsub.f32 %v1050_v41, %v1053_v53 }
 0x40e   : > { %v1055_v55 = vmul.f32 1.442695, %v1054_v54 }
 0x40f   : > { %v1412_v57 = vpop.xlane.xlu1 %1411 }
 0x410   : > { %4506 = vpow2.f32 %v1055_v55  ;;  %v1413_v58 = vmul.f32 0.03125, %v1412_v57  ;;  %v3957_v55 = vld [vmem:[#allocation2 + $0x1] ss:$0 sm:$0xff] }
 0x412   : > { %v4990_v59 = vsub.f32 %v4983_v43, %v1413_v58 }
 0x413   : > { %v1219_v60 = vpop.xlane.xlu0 %1218 }
 0x414   : > { %v4505_v61 = vpop.eup %4504  ;;  %v1220_v62 = vsub.f32 %v1216_v47, %v1219_v60  ;;  %v1415_v63 = vmul.f32 %v4990_v59, %v4990_v59  ;;  %v1322_v47 = vld [vmem:[%s5488_s6 + $0x8] sm:$0xff] }
 0x415   : > { %v725_v1 = vsel %vm643_vm2, %v4505_v61, 0.0  ;;  %4229 = vmatpush3.msra.mxu0 %v1322_v47 }
 0x416   : > { %v1221_v2 = vmul.f32 1.442695, %v1220_v62  ;;  %726 = vadd.xlane.f32.xlu0 %v725_v1  ;;  %v1416_v3 = vsel %vm527_vm0, %v1415_v63, 0.0  ;;  %4230 = vmatprep.subr.mxu0 %v4708_v8 }
 0x417   : > { %1417 = vadd.xlane.f32.xlu1 %v1416_v3  ;;  %4231 = vmatpush3.msra.mxu0 %v1321_v48 }
 0x418   : > { %4508 = vpow2.f32 %v1221_v2  ;;  %4246 = vmatprep.subr.mxu0 %v4708_v8 }
 0x419   : > { %4510 = vpow2.f32 %v889_v10 }
 0x41d   : > { %v4507_v4 = vpop.eup %4506 }
 0x41e   : > { %v1057_v5 = vsel %vm643_vm2, %v4507_v4, 0.0 }
 0x41f   : > { %1058 = vadd.xlane.f32.xlu0 %v1057_v5 }
 0x425   : > { %v4509_v6 = vpop.eup %4508 }
 0x426   : > { %v1223_v7 = vsel %vm643_vm2, %v4509_v6, 0.0  ;;  %v4511_v11 = vpop.eup %4510 }
 0x427   : > { %1224 = vadd.xlane.f32.xlu0 %v1223_v7  ;;  %v891_v12 = vsel %vm643_vm2, %v4511_v11, 0.0 }
 0x428   : > { %730 = vrot.lane.b32.xlu1 %v4940_v23, %s5502_s21  ;;  %s4721_s21 = smov 8  }
 0x43d   : > { %896 = vrot.lane.b32.xlu0 %v4940_v23, %s5496_s14  ;;  %s5523_s14 = smov 56  }
 0x44c   : > { %892 = vadd.xlane.f32.xlu1 %v891_v12 }
 0x45d   : > { %1062 = vrot.lane.b32.xlu1 %v4940_v23, %s5500_s24  ;;  %s5516_s24 = smov 16  }
 0x461   : > { %1228 = vrot.lane.b32.xlu1 %v4940_v23, %s5498_s28 }
 0x49f   : > { %v727_v13 = vpop.xlane.xlu0 %726 }
 0x4a0   : > { %4512 = vrcp.f32 %v727_v13  ;;  %v1418_v14 = vpop.xlane.xlu1 %1417 }
 0x4a1   : > { %v1419_v21 = vmul.f32 0.03125, %v1418_v14 }
 0x4a3   : > { %v1420_v23 = vadd.f32 1e-05, %v1419_v21 }
 0x4a4   : > { %v731_v15 = vpop.permute.xlu1 %730 }
 0x4a5   : > { %4190 = vmatpush3.msra.mxu1 %v731_v15 }
 0x4a6   : > { %4199 = vmatprep.subr.mxu1 %v4708_v8 }
 0x4a8   : > { %v1059_v16 = vpop.xlane.xlu0 %1058 }
 0x4ad   : > { %v4513_v17 = vpop.eup %4512 }
 0x4ae   : > { %v729_v18 = vmul.f32 %v4513_v17, %v4505_v61 }
 0x4b0   : > { %4192 = vmatmul.mubr.msk.f32.vlgmr.msra.gmra.mxu1 %vm643_vm2, %v729_v18  ;;  %v1225_v19 = vpop.xlane.xlu0 %1224 }
 0x4b1   : > { %4201 = vmatprep.mubr.msk.f32.mxu1 %vm4709_vm1, %v4708_v8 }
 0x4b4   : > { %v897_v20 = vpop.permute.xlu0 %896 }
 0x4b5   : > { %4200 = vmatpush3.msra.mxu1 %v897_v20 }
 0x4b6   : > { %4209 = vmatprep.subr.mxu1 %v4708_v8 }
 0x4d5   : > { %v893_v22 = vpop.xlane.xlu1 %892 }
 0x4d6   : > { %4514 = vrcp.f32 %v893_v22 }
 0x4d7   : > { %4516 = vrcp.f32 %v1059_v16 }
 0x4d8   : > { %4518 = vrsqrt.f32 %v1420_v23 }
 0x4d9   : > { %4520 = vrcp.f32 %v1225_v19  ;;  %v1063_v25 = vpop.permute.xlu1 %1062 }
 0x4dd   : > { %v1229_v31 = vpop.permute.xlu1 %1228 }
 0x4e3   : > { %v4515_v24 = vpop.eup %4514 }
 0x4e4   : > { %v895_v26 = vmul.f32 %v4515_v24, %v4511_v11  ;;  %v4517_v27 = vpop.eup %4516 }
 0x4e5   : > { %v4519_v28 = vpop.eup %4518  ;;  %v1061_v29 = vmul.f32 %v4517_v27, %v4507_v4 }
 0x4e6   : > { %4202 = vmatmul.mubr.msk.f32.vlgmr.msra.gmra.mxu1 %vm643_vm2, %v895_v26  ;;  %v4521_v30 = vpop.eup %4520  ;;  %v1422_v32 = vmul.f32 %v4519_v28, %v4990_v59 }
 0x4e7   : > { %4210 = vmatpush3.msra.mxu1 %v1063_v25  ;;  %4211 = vmatprep.mubr.msk.f32.mxu1 %vm4709_vm1, %v4708_v8  ;;  %v1227_v33 = vmul.f32 %v4521_v30, %v4509_v6 }
 0x4e8   : > { %4219 = vmatprep.subr.mxu1 %v4708_v8  ;;  %v1429_v38 = vmul.f32 %v3951_v35, %v1422_v32 }
 0x4ea   : > { %4212 = vmatmul.mubr.msk.f32.vlgmr.msra.gmra.mxu1 %vm643_vm2, %v1061_v29  ;;  %v1436_v41 = vadd.f32 %v3952_v39, %v1429_v38 }
 0x4eb   : > { %4220 = vmatpush3.msra.mxu1 %v1229_v31  ;;  %4221 = vmatprep.mubr.msk.f32.mxu1 %vm4709_vm1, %v4708_v8 }
 0x4ec   : > { %4235 = vmatprep.subr.mxu1 %v4708_v8 }
 0x4ee   : > { %4222 = vmatmul.mubr.msk.f32.vlgmr.msra.gmra.mxu1 %vm643_vm2, %v1227_v33 }
 0x4ef   : > { %4236 = vmatpush3.msra.mxu1 %v3956_v34  ;;  %4243 = vmatprep.mubr.msk.f32.mxu1 %vm4709_vm1, %v4708_v8 }
 0x4f0   : > { %4237 = vmatprep.subr.mxu1 %v4708_v8 }
 0x4f1   : > { %4238 = vmatpush3.msra.mxu1 %v3955_v36 }
 0x4f2   : > { %4239 = vmatprep.subr.mxu1 %v4708_v8 }
 0x4f3   : > { %4240 = vmatpush3.msra.mxu1 %v3954_v37 }
 0x4f4   : > { %4241 = vmatprep.subr.mxu1 %v4708_v8 }
 0x4f5   : > { %4242 = vmatpush3.msra.mxu1 %v3953_v40 }
 0x4f6   : > { %4244 = vmatmul.mubr.msk.f32.vlgmr.msra.gmra.mxu1 %vm527_vm0, %v1436_v41  ;;  %4251 = vmatprep.subr.mxu1 %v4708_v8 }
 0x4f7   : > { %4253 = vmatprep.mubr.msk.f32.mxu1 %vm4709_vm1, %v4708_v8 }
 0x570   : > { %v802_v42 = vpop.f32.mrf.mxu1 }
 0x572   : > { %v4193_v44 = vpop.f32.mrf.mxu1 }
 0x5a6   : > { %v968_v49 = vpop.f32.mrf.mxu1 }
 0x5a7   : > { %1305 = vrot.lane.b32.xlu0 %v968_v49, %s4721_s21 }
 0x5a8   : > { %v4203_v50 = vpop.f32.mrf.mxu1 }
 0x5aa   : > { %v1134_v51 = vpop.f32.mrf.mxu1 }
 0x5ab   : > { %1309 = vrot.lane.b32.xlu1 %v1134_v51, %s5516_s24 }
 0x5ac   : > { %v4213_v52 = vpop.f32.mrf.mxu1 }
 0x5ae   : > { %v1300_v53 = vpop.f32.mrf.mxu1 }
 0x5af   : > { %1313 = vrot.lane.b32.xlu0 %v1300_v53, %s5514_s18 }
 0x5b0   : > { %v4223_v54 = vpop.f32.mrf.mxu1 }
 0x5b6   : > { %v1519_v56 = vpop.f32.mrf.mxu1 }
 0x5b7   : > { %v5068_v57 = vadd.f32 %v3957_v55, %v1519_v56 }
 0x5b8   : > { %v4245_v58 = vpop.f32.mrf.mxu1 }
 0x5b9   : > { %1690 = vrot.lane.b32.xlu0 %v5068_v57, %s4712_s19  ;;  %1524 = vrot.lane.b32.xlu1 %v5068_v57, %s4711_s17 }
 0x5bd   : > { %1856 = vrot.lane.b32.xlu0 %v5068_v57, %s5510_s26  ;;  %1688 = vrot.lane.b32.xlu1 %v5068_v57, %s5512_s15 }
 0x5c1   : > { %2022 = vrot.lane.b32.xlu0 %v5068_v57, %s5506_s23  ;;  %1854 = vrot.lane.b32.xlu1 %v5068_v57, %s5508_s22  ;;  %s5530_s23 = smov 24   ;;  %s518_s22 = scalar_lea.vmem %s5494_s12, %s4897_s27 }
 0x5c5   : > { %2020 = vrot.lane.b32.xlu1 %v5068_v57, %s5504_s16 }
 0x619   : > { %v1306_v59 = vpop.permute.xlu0 %1305 }
 0x61a   : > { %v1316_v61 = vsel %vm643_vm2, %v802_v42, %v1306_v59 }
 0x61d   : > { %v1310_v60 = vpop.permute.xlu1 %1309 }
 0x61e   : > { %v1318_v62 = vsel %vm1317_vm3, %v1316_v61, %v1310_v60 }
 0x621   : > { %v1314_v63 = vpop.permute.xlu0 %1313 }
 0x622   : > { %v1320_v1 = vsel %vm1319_vm4, %v1318_v62, %v1314_v63 }
 0x623   : > { %4233 = vmatmul.mubr.msk.f32.vlgmr.msra.gmra.mxu0 %vm527_vm0, %v1320_v1 }
 0x624   : > { %4248 = vmatprep.mubr.msk.f32.mxu0 %vm4709_vm1, %v4708_v8 }
 0x62b   : > { %v1691_v2 = vpop.permute.xlu0 %1690  ;;  %v1525_v3 = vpop.permute.xlu1 %1524 }
 0x62c   : > { %4247 = vmatpush3.xpose.msk.msra.mxu0 %vm643_vm2, %v1525_v3  ;;  %v3973_v3 = vld [vmem:[%s5488_s6 + $0x30] sm:$0xff] }
 0x62d   : > { %4256 = vmatprep.subr.mxu0 %v4708_v8 }
 0x62f   : > { %4249 = vmatmul.mubr.msk.f32.vlgmr.msra.gmra.mxu0 %vm643_vm2, %v5068_v57  ;;  %v1689_v4 = vpop.permute.xlu1 %1688  ;;  %v1857_v5 = vpop.permute.xlu0 %1856 }
 0x630   : > { %4257 = vmatpush3.xpose.msk.msra.mxu0 %vm643_vm2, %v1691_v2  ;;  %4258 = vmatprep.mubr.msk.f32.mxu0 %vm4709_vm1, %v4708_v8  ;;  %v3974_v2 = vld [vmem:[%s5488_s6 + $0x38] sm:$0xff] }
 0x631   : > { %4266 = vmatprep.subr.mxu0 %v4708_v8 }
 0x633   : > { %4259 = vmatmul.mubr.msk.f32.vlgmr.msra.gmra.mxu0 %vm643_vm2, %v1689_v4  ;;  %v1855_v6 = vpop.permute.xlu1 %1854  ;;  %v2023_v7 = vpop.permute.xlu0 %2022  ;;  %v3972_v4 = vld [vmem:[%s5488_s6 + $0x28] sm:$0xff] }
 0x634   : > { %4267 = vmatpush3.xpose.msk.msra.mxu0 %vm643_vm2, %v1857_v5  ;;  %4268 = vmatprep.mubr.msk.f32.mxu0 %vm4709_vm1, %v4708_v8 }
 0x635   : > { %4276 = vmatprep.subr.mxu0 %v4708_v8 }
 0x637   : > { %4269 = vmatmul.mubr.msk.f32.vlgmr.msra.gmra.mxu0 %vm643_vm2, %v1855_v6  ;;  %v2021_v9 = vpop.permute.xlu1 %2020  ;;  %v3971_v6 = vld [vmem:[%s5488_s6 + $0x20] sm:$0xff] }
 0x638   : > { %4277 = vmatpush3.xpose.msk.msra.mxu0 %vm643_vm2, %v2023_v7  ;;  %4278 = vmatprep.mubr.msk.f32.mxu0 %vm4709_vm1, %v4708_v8 }
 0x639   : > { %4286 = vmatprep.subr.mxu0 %v4708_v8 }
 0x63b   : > { %4279 = vmatmul.mubr.msk.f32.vlgmr.msra.gmra.mxu0 %vm643_vm2, %v2021_v9 }
 0x63c   : > { %4294 = vmatprep.mubr.msk.f32.mxu0 %vm4709_vm1, %v4708_v8  ;;  %4287 = vmatpush3.msra.mxu0 %v3974_v2 }
 0x63d   : > { %4288 = vmatprep.subr.mxu0 %v4708_v8 }
 0x63e   : > { %4289 = vmatpush3.msra.mxu0 %v3973_v3 }
 0x63f   : > { %4290 = vmatprep.subr.mxu0 %v4708_v8 }
 0x640   : > { %4291 = vmatpush3.msra.mxu0 %v3972_v4 }
 0x641   : > { %4292 = vmatprep.subr.mxu0 %v4708_v8 }
 0x642   : > { %4293 = vmatpush3.msra.mxu0 %v3971_v6 }
 0x6e3   : > { %v5111_v10 = vpop.f32.mrf.mxu0 }
 0x6e5   : > { %v4234_v11 = vpop.f32.mrf.mxu0 }
 0x6ef   : > { %v1596_v12 = vpop.f32.mrf.mxu0 }
 0x6f0   : > { %v1600_v13 = vmul.f32 0.35355338, %v1596_v12 }
 0x6f1   : > { %v4250_v14 = vpop.f32.mrf.mxu0 }
 0x6f2   : > { %v1601_v15 = vsel %vm643_vm2, %v1600_v13, -inf }
 0x6f3   : > { %1602 = vmax.xlane.f32.xlu0 %v1601_v15  ;;  %v1762_v16 = vpop.f32.mrf.mxu0 }
 0x6f4   : > { %v1766_v17 = vmul.f32 0.35355338, %v1762_v16  ;;  %v3947_v16 = vld [vmem:[#allocation4] ss:$0 sm:$0xff] }
 0x6f5   : > { %v4260_v18 = vpop.f32.mrf.mxu0 }
 0x6f6   : > { %v1767_v19 = vsel %vm643_vm2, %v1766_v17, -inf }
 0x6f7   : > { %1768 = vmax.xlane.f32.xlu1 %v1767_v19  ;;  %v1928_v20 = vpop.f32.mrf.mxu0 }
 0x6f8   : > { %v1932_v21 = vmul.f32 0.35355338, %v1928_v20 }
 0x6f9   : > { %v4270_v22 = vpop.f32.mrf.mxu0 }
 0x6fa   : > { %v1933_v23 = vsel %vm643_vm2, %v1932_v21, -inf }
 0x6fb   : > { %1934 = vmax.xlane.f32.xlu0 %v1933_v23  ;;  %v2094_v24 = vpop.f32.mrf.mxu0 }
 0x6fc   : > { %v2098_v25 = vmul.f32 0.35355338, %v2094_v24 }
 0x6fd   : > { %v4280_v26 = vpop.f32.mrf.mxu0 }
 0x6fe   : > { %v2099_v27 = vsel %vm643_vm2, %v2098_v25, -inf }
 0x6ff   : > { %2100 = vmax.xlane.f32.xlu0 %v2099_v27  ;;  %v3975_v27 = vld [vmem:[#allocation4 + $0x1] ss:$0 sm:$0xff] }
 0x708   : > { %1612 = vrot.lane.b32.xlu1 %v5068_v57, %s5520_s20 }
 0x77c   : > { %v1603_v28 = vpop.xlane.xlu0 %1602 }
 0x77d   : > { %v1604_v29 = vsub.f32 %v1600_v13, %v1603_v28 }
 0x77f   : > { %v1605_v30 = vmul.f32 1.442695, %v1604_v29 }
 0x780   : > { %v1769_v31 = vpop.xlane.xlu1 %1768 }
 0x781   : > { %4522 = vpow2.f32 %v1605_v30  ;;  %v1770_v32 = vsub.f32 %v1766_v17, %v1769_v31  ;;  %v1402_v17 = vadd.f32 %v3947_v16, %v5111_v10 }
 0x783   : > { %v1771_v33 = vmul.f32 1.442695, %v1770_v32  ;;  %v5162_v18 = vadd.f32 %v1402_v17, %v4903_v0 }
 0x784   : > { %v1613_v34 = vpop.permute.xlu1 %1612  ;;  %v1935_v35 = vpop.xlane.xlu0 %1934 }
 0x785   : > { %4524 = vpow2.f32 %v1771_v33  ;;  %v1936_v36 = vsub.f32 %v1932_v21, %v1935_v35  ;;  %4252 = vmatpush3.msra.mxu1 %v1613_v34  ;;  %v2292_v19 = vsel %vm527_vm0, %v5162_v18, 0.0 }
 0x786   : > { %4261 = vmatprep.subr.mxu1 %v4708_v8 }
 0x787   : > { %v1937_v37 = vmul.f32 1.442695, %v1936_v36 }
 0x788   : > { %v2101_v38 = vpop.xlane.xlu0 %2100 }
 0x789   : > { %4526 = vpow2.f32 %v1937_v37  ;;  %v2102_v39 = vsub.f32 %v2098_v25, %v2101_v38 }
 0x78b   : > { %v2103_v40 = vmul.f32 1.442695, %v2102_v39 }
 0x78d   : > { %4528 = vpow2.f32 %v2103_v40 }
 0x78e   : > { %v4523_v41 = vpop.eup %4522 }
 0x78f   : > { %v1607_v42 = vsel %vm643_vm2, %v4523_v41, 0.0 }
 0x790   : > { %1608 = vadd.xlane.f32.xlu1 %v1607_v42 }
 0x792   : > { %v4525_v44 = vpop.eup %4524 }
 0x793   : > { %v1773_v45 = vsel %vm643_vm2, %v4525_v44, 0.0 }
 0x794   : > { %1774 = vadd.xlane.f32.xlu0 %v1773_v45 }
 0x796   : > { %v4527_v46 = vpop.eup %4526 }
 0x797   : > { %v1939_v47 = vsel %vm643_vm2, %v4527_v46, 0.0 }
 0x798   : > { %1940 = vadd.xlane.f32.xlu1 %v1939_v47 }
 0x79a   : > { %v4529_v48 = vpop.eup %4528 }
 0x79b   : > { %v2105_v49 = vsel %vm643_vm2, %v4529_v48, 0.0 }
 0x79c   : > { %2106 = vadd.xlane.f32.xlu0 %v2105_v49  ;;  %v3984_v49 = vld [vmem:[%s5486_s4 + $0x58] sm:$0xff] }
 0x7a9   : > { %1944 = vrot.lane.b32.xlu1 %v5068_v57, %s5521_s30 }
 0x7ad   : > { %2110 = vrot.lane.b32.xlu1 %v5068_v57, %s5522_s29 }
 0x7b2   : > { %1778 = vrot.lane.b32.xlu0 %v5068_v57, %s5523_s14 }
 0x819   : > { %v1609_v50 = vpop.xlane.xlu1 %1608 }
 0x81a   : > { %4530 = vrcp.f32 %v1609_v50  ;;  %v3983_v50 = vld [vmem:[%s5486_s4 + $0x50] sm:$0xff] }
 0x81d   : > { %v1775_v51 = vpop.xlane.xlu0 %1774 }
 0x81e   : > { %4532 = vrcp.f32 %v1775_v51  ;;  %v3982_v51 = vld [vmem:[%s5486_s4 + $0x48] sm:$0xff] }
 0x821   : > { %v1941_v52 = vpop.xlane.xlu1 %1940 }
 0x822   : > { %4534 = vrcp.f32 %v1941_v52  ;;  %v3981_v52 = vld [vmem:[%s5486_s4 + $0x40] sm:$0xff] }
 0x825   : > { %v2107_v53 = vpop.xlane.xlu0 %2106  ;;  %v1945_v59 = vpop.permute.xlu1 %1944 }
 0x826   : > { %4536 = vrcp.f32 %v2107_v53 }
 0x827   : > { %v4531_v54 = vpop.eup %4530 }
 0x828   : > { %v1611_v55 = vmul.f32 %v4531_v54, %v4523_v41 }
 0x829   : > { %v1779_v56 = vpop.permute.xlu0 %1778  ;;  %v2111_v62 = vpop.permute.xlu1 %2110 }
 0x82a   : > { %4254 = vmatmul.mubr.msk.f32.vlgmr.msra.gmra.mxu1 %vm643_vm2, %v1611_v55 }
 0x82b   : > { %v4533_v58 = vpop.eup %4532  ;;  %4262 = vmatpush3.msra.mxu1 %v1779_v56  ;;  %4263 = vmatprep.mubr.msk.f32.mxu1 %vm4709_vm1, %v4708_v8 }
 0x82c   : > { %4271 = vmatprep.subr.mxu1 %v4708_v8  ;;  %v1777_v57 = vmul.f32 %v4533_v58, %v4525_v44  ;;  %v3979_v44 = vld [vmem:[%s5484_s2 + $0x2] ss:$0 sm:$0xff] }
 0x82e   : > { %4264 = vmatmul.mubr.msk.f32.vlgmr.msra.gmra.mxu1 %vm643_vm2, %v1777_v57 }
 0x82f   : > { %v4535_v60 = vpop.eup %4534  ;;  %4272 = vmatpush3.msra.mxu1 %v1945_v59  ;;  %4273 = vmatprep.mubr.msk.f32.mxu1 %vm4709_vm1, %v4708_v8 }
 0x830   : > { %4281 = vmatprep.subr.mxu1 %v4708_v8  ;;  %v1943_v61 = vmul.f32 %v4535_v60, %v4527_v46  ;;  %v3980_v46 = vld [vmem:[%s5485_s3 + $0x2] ss:$0 sm:$0xff] }
 0x831   : > { %v3985_v60 = vld [vmem:[#allocation2 + $0x2] ss:$0 sm:$0xff] }
 0x832   : > { %4274 = vmatmul.mubr.msk.f32.vlgmr.msra.gmra.mxu1 %vm643_vm2, %v1943_v61 }
 0x833   : > { %v4537_v63 = vpop.eup %4536  ;;  %4282 = vmatpush3.msra.mxu1 %v2111_v62  ;;  %4283 = vmatprep.mubr.msk.f32.mxu1 %vm4709_vm1, %v4708_v8 }
 0x834   : > { %v2109_v1 = vmul.f32 %v4537_v63, %v4529_v48  ;;  %4297 = vmatprep.subr.mxu1 %v3984_v49 }
 0x836   : > { %4284 = vmatmul.mubr.msk.f32.vlgmr.msra.gmra.mxu1 %vm643_vm2, %v2109_v1 }
 0x837   : > { %4298 = vmatpush3.msra.mxu1 %v3984_v49 }
 0x838   : > { %4299 = vmatprep.subr.mxu1 %v3983_v50 }
 0x839   : > { %4300 = vmatpush3.msra.mxu1 %v3983_v50 }
 0x83a   : > { %4301 = vmatprep.subr.mxu1 %v3982_v51 }
 0x83b   : > { %4302 = vmatpush3.msra.mxu1 %v3982_v51 }
 0x83c   : > { %4303 = vmatprep.subr.mxu1 %v3981_v52 }
 0x83d   : > { %4304 = vmatpush3.msra.mxu1 %v3981_v52 }
 0x8ea   : > { %v1684_v5 = vpop.f32.mrf.mxu1 }
 0x8ec   : > { %v4255_v7 = vpop.f32.mrf.mxu1 }
 0x8ee   : > { %v1850_v9 = vpop.f32.mrf.mxu1 }
 0x8ef   : > { %2187 = vrot.lane.b32.xlu0 %v1850_v9, %s4721_s21 }
 0x8f0   : > { %v4265_v11 = vpop.f32.mrf.mxu1 }
 0x8f2   : > { %v2016_v12 = vpop.f32.mrf.mxu1 }
 0x8f3   : > { %2191 = vrot.lane.b32.xlu1 %v2016_v12, %s5516_s24  ;;  %s5526_s24 = smov 112  }
 0x8f4   : > { %v4275_v13 = vpop.f32.mrf.mxu1 }
 0x8f6   : > { %v2182_v14 = vpop.f32.mrf.mxu1 }
 0x8f7   : > { %2195 = vrot.lane.b32.xlu0 %v2182_v14, %s5514_s18  ;;  %s5527_s18 = smov 72  }
 0x8f8   : > { %v4285_v15 = vpop.f32.mrf.mxu1 }
 0x917   : > { %2293 = vadd.xlane.f32.xlu1 %v2292_v19 }
 0x961   : > { %v2188_v20 = vpop.permute.xlu0 %2187 }
 0x962   : > { %v2198_v22 = vsel %vm643_vm2, %v1684_v5, %v2188_v20 }
 0x965   : > { %v2192_v21 = vpop.permute.xlu1 %2191 }
 0x966   : > { %v2199_v23 = vsel %vm1317_vm3, %v2198_v22, %v2192_v21 }
 0x969   : > { %v2196_v24 = vpop.permute.xlu0 %2195 }
 0x96a   : > { %v2200_v25 = vsel %vm1319_vm4, %v2199_v23, %v2196_v24 }
 0x96b   : > { %4295 = vmatmul.mubr.msk.f32.vlgmr.msra.gmra.mxu0 %vm527_vm0, %v2200_v25 }
 0x9a0   : > { %v2294_v26 = vpop.xlane.xlu1 %2293 }
 0x9a1   : > { %v2298_v10 = vmul.f32 0.03125, %v2294_v26 }
 0x9a3   : > { %v2300_v28 = vsub.f32 %v5162_v18, %v2298_v10 }
 0x9a5   : > { %v2302_v33 = vmul.f32 %v2300_v28, %v2300_v28 }
 0x9a7   : > { %v2304_v34 = vsel %vm527_vm0, %v2302_v33, 0.0 }
 0xa2b   : > { %v2283_v0 = vpop.f32.mrf.mxu0 }
 0xa2c   : > { %v2284_v29 = vadd.f32 %v3975_v27, %v2283_v0 }
 0xa2d   : > { %v4296_v30 = vpop.f32.mrf.mxu0 }
 0xa2e   : > { %v5172_v31 = vadd.f32 %v2284_v29, %v4983_v43 }
 0xa30   : > { %v2295_v32 = vsel %vm527_vm0, %v5172_v31, 0.0 }
 0xa31   : > { %2296 = vadd.xlane.f32.xlu0 %v2295_v32 }
 0xa35   : > { %2305 = vadd.xlane.f32.xlu0 %v2304_v34 }
 0xaba   : > { %v2297_v35 = vpop.xlane.xlu0 %2296 }
 0xabb   : > { %v2299_v36 = vmul.f32 0.03125, %v2297_v35 }
 0xabd   : > { %v2301_v37 = vsub.f32 %v5172_v31, %v2299_v36 }
 0xabe   : > { %v2306_v38 = vpop.xlane.xlu0 %2305 }
 0xabf   : > { %v2310_v39 = vmul.f32 0.03125, %v2306_v38  ;;  %v2303_v40 = vmul.f32 %v2301_v37, %v2301_v37 }
 0xac1   : > { %v2312_v41 = vadd.f32 1e-05, %v2310_v39  ;;  %v2307_v42 = vsel %vm527_vm0, %v2303_v40, 0.0 }
 0xac2   : > { %2308 = vadd.xlane.f32.xlu1 %v2307_v42 }
 0xac3   : > { %4538 = vrsqrt.f32 %v2312_v41 }
 0xad0   : > { %v4539_v43 = vpop.eup %4538 }
 0xad1   : > { %v2316_v45 = vmul.f32 %v4539_v43, %v2300_v28 }
 0xad3   : > { %v2324_v47 = vmul.f32 %v3979_v44, %v2316_v45 }
 0xad5   : > { %v2332_v48 = vadd.f32 %v3980_v46, %v2324_v47 }
 0xad7   : > { %4305 = vmatprep.mubr.msk.f32.mxu1 %vm527_vm0, %v2332_v48 }
 0xb4b   : > { %v2309_v53 = vpop.xlane.xlu1 %2308 }
 0xb4c   : > { %v2311_v54 = vmul.f32 0.03125, %v2309_v53 }
 0xb4e   : > { %v2313_v55 = vadd.f32 1e-05, %v2311_v54 }
 0xb50   : > { %4540 = vrsqrt.f32 %v2313_v55 }
 0xb5d   : > { %v4541_v56 = vpop.eup %4540 }
 0xb5e   : > { %v2317_v58 = vmul.f32 %v4541_v56, %v2301_v37 }
 0xb60   : > { %v2325_v59 = vmul.f32 %v3979_v44, %v2317_v58 }
 0xb62   : > { %v2333_v57 = vadd.f32 %v3980_v46, %v2325_v59 }
 0xb64   : > { %4306 = vmatmul.mubr.msk.f32.vlgmr.msra.gmra.mxu1 %vm527_vm0, %v2333_v57 }
 0xc24   : > { %v4307_v61 = vpop.f32.mrf.mxu1 }
 0xc25   : > { %v5199_v62 = vadd.f32 %v4307_v61, %v3985_v60 }
 0xc26   : > { %v2419_v63 = vpop.f32.mrf.mxu1 }
 0xc27   : > { %v5201_v1 = vadd.f32 %v3985_v60, %v2419_v63  ;;  %2432 = vrot.lane.b32.xlu0 %v5199_v62, %s4711_s17 }
 0xc29   : > { %2430 = vrot.lane.b32.xlu1 %v5201_v1, %s4711_s17  ;;  %4312 = vmatprep.mubr.msk.f32.mxu0 %vm643_vm2, %v5201_v1  ;;  %s5524_s17 = smov 120  }
 0xc99   : > { %v2433_v2 = vpop.permute.xlu0 %2432 }
 0xc9a   : > { %4308 = vmatprep.subr.msk.mxu0 %vm643_vm2, %v2433_v2 }
 0xc9b   : > { %4309 = vmatpush3.xpose.msk.msra.mxu0 %vm643_vm2, %v2433_v2  ;;  %v2431_v3 = vpop.permute.xlu1 %2430 }
 0xc9c   : > { %4310 = vmatprep.subr.msk.mxu0 %vm643_vm2, %v2431_v3 }
 0xc9f   : > { %4311 = vmatpush3.xpose.msk.msra.mxu0 %vm643_vm2, %v2431_v3 }
 0xca2   : > { %4313 = vmatmul.mubr.msk.f32.vlgmr.msra.gmra.mxu0 %vm643_vm2, %v5199_v62 }
 0xd62   : > { %v4314_v4 = vpop.f32.mrf.mxu0 }
 0xd63   : > { %v2518_v5 = vmul.f32 0.35355338, %v4314_v4 }
 0xd64   : > { %v2508_v6 = vpop.f32.mrf.mxu0 }
 0xd65   : > { %v2517_v7 = vmul.f32 0.35355338, %v2508_v6  ;;  %v2522_v9 = vsel %vm1317_vm3, %v2518_v5, -inf }
 0xd66   : > { %2523 = vmax.xlane.f32.xlu0 %v2522_v9 }
 0xd67   : > { %v2519_v11 = vsel %vm1317_vm3, %v2517_v7, -inf }
 0xd68   : > { %2520 = vmax.xlane.f32.xlu1 %v2519_v11 }
 0xdef   : > { %v2524_v12 = vpop.xlane.xlu0 %2523 }
 0xdf0   : > { %v2526_v13 = vsub.f32 %v2518_v5, %v2524_v12 }
 0xdf1   : > { %v2521_v14 = vpop.xlane.xlu1 %2520 }
 0xdf2   : > { %v2529_v15 = vmul.f32 1.442695, %v2526_v13  ;;  %v2525_v16 = vsub.f32 %v2517_v7, %v2521_v14 }
 0xdf4   : > { %4542 = vpow2.f32 %v2529_v15  ;;  %v2527_v17 = vmul.f32 1.442695, %v2525_v16 }
 0xdf6   : > { %4544 = vpow2.f32 %v2527_v17 }
 0xe01   : > { %v4543_v19 = vpop.eup %4542 }
 0xe02   : > { %v2534_v20 = vsel %vm1317_vm3, %v4543_v19, 0.0 }
 0xe03   : > { %v4545_v21 = vpop.eup %4544  ;;  %2535 = vadd.xlane.f32.xlu1 %v2534_v20 }
 0xe04   : > { %v2531_v22 = vsel %vm1317_vm3, %v4545_v21, 0.0 }
 0xe05   : > { %2532 = vadd.xlane.f32.xlu0 %v2531_v22 }
 0xe14   : > { %2541 = vrot.lane.b32.xlu1 %v5201_v1, %s5520_s20 }
 0xe18   : > { %2634 = vrot.lane.b32.xlu1 %v5199_v62, %s4712_s19 }
 0xe1b   : > { %2543 = vrot.lane.b32.xlu0 %v5199_v62, %s5520_s20  ;;  %s5528_s20 = smov 104  }
 0xe1c   : > { %2628 = vrot.lane.b32.xlu1 %v5201_v1, %s5524_s17 }
 0xe1f   : > { %2632 = vrot.lane.b32.xlu0 %v5201_v1, %s4712_s19  ;;  %s5525_s19 = smov 80  }
 0xe23   : > { %2630 = vrot.lane.b32.xlu0 %v5199_v62, %s5524_s17 }
 0xe8c   : > { %v2536_v23 = vpop.xlane.xlu1 %2535 }
 0xe8d   : > { %4546 = vrcp.f32 %v2536_v23 }
 0xe8e   : > { %v2533_v24 = vpop.xlane.xlu0 %2532 }
 0xe8f   : > { %4548 = vrcp.f32 %v2533_v24 }
 0xe90   : > { %v2542_v25 = vpop.permute.xlu1 %2541 }
 0xe92   : > { %v2544_v26 = vpop.permute.xlu0 %2543 }
 0xe93   : > { %4315 = vmatprep.subr.mxu1 %v2544_v26 }
 0xe94   : > { %4316 = vmatpush3.msra.mxu1 %v2544_v26  ;;  %v2635_v10 = vpop.permute.xlu1 %2634 }
 0xe95   : > { %4317 = vmatprep.subr.mxu1 %v2542_v25 }
 0xe96   : > { %4318 = vmatpush3.msra.mxu1 %v2542_v25  ;;  %v2633_v32 = vpop.permute.xlu0 %2632 }
 0xe97   : > { %4322 = vmatprep.subr.msk.mxu1 %vm643_vm2, %v2635_v10 }
 0xe98   : > { %v2629_v30 = vpop.permute.xlu1 %2628 }
 0xe9a   : > { %v4547_v27 = vpop.eup %4546  ;;  %v2631_v33 = vpop.permute.xlu0 %2630 }
 0xe9b   : > { %v2540_v29 = vmul.f32 %v4547_v27, %v4543_v19 }
 0xe9c   : > { %v4549_v0 = vpop.eup %4548 }
 0xe9d   : > { %v2539_v28 = vmul.f32 %v4549_v0, %v4545_v21 }
 0xe9f   : > { %4319 = vmatprep.mubr.msk.f32.mxu1 %vm1317_vm3, %v2539_v28 }
 0xea0   : > { %4320 = vmatmul.mubr.msk.f32.vlgmr.msra.gmra.mxu1 %vm1317_vm3, %v2540_v29 }
 0xea1   : > { %4323 = vmatpush3.xpose.msk.msra.mxu1 %vm643_vm2, %v2635_v10  ;;  %4326 = vmatprep.mubr.msk.f32.mxu1 %vm643_vm2, %v2629_v30 }
 0xea2   : > { %4324 = vmatprep.subr.msk.mxu1 %vm643_vm2, %v2633_v32 }
 0xea5   : > { %4325 = vmatpush3.xpose.msk.msra.mxu1 %vm643_vm2, %v2633_v32 }
 0xea8   : > { %4327 = vmatmul.mubr.msk.f32.vlgmr.msra.gmra.mxu1 %vm643_vm2, %v2631_v33 }
 0xf60   : > { %v5239_v34 = vpop.f32.mrf.mxu1 }
 0xf62   : > { %v5241_v35 = vpop.f32.mrf.mxu1 }
 0xf68   : > { %v4328_v36 = vpop.f32.mrf.mxu1 }
 0xf69   : > { %v2720_v37 = vmul.f32 0.35355338, %v4328_v36 }
 0xf6a   : > { %v2710_v38 = vpop.f32.mrf.mxu1 }
 0xf6b   : > { %v2719_v39 = vmul.f32 0.35355338, %v2710_v38  ;;  %v2724_v40 = vsel %vm1317_vm3, %v2720_v37, -inf }
 0xf6c   : > { %2725 = vmax.xlane.f32.xlu0 %v2724_v40 }
 0xf6d   : > { %v2721_v41 = vsel %vm1317_vm3, %v2719_v39, -inf }
 0xf6e   : > { %2722 = vmax.xlane.f32.xlu1 %v2721_v41 }
 0xff5   : > { %v2726_v42 = vpop.xlane.xlu0 %2725 }
 0xff6   : > { %v2728_v43 = vsub.f32 %v2720_v37, %v2726_v42 }
 0xff7   : > { %v2723_v44 = vpop.xlane.xlu1 %2722 }
 0xff8   : > { %v2731_v45 = vmul.f32 1.442695, %v2728_v43  ;;  %v2727_v46 = vsub.f32 %v2719_v39, %v2723_v44 }
 0xffa   : > { %4550 = vpow2.f32 %v2731_v45  ;;  %v2729_v47 = vmul.f32 1.442695, %v2727_v46 }
 0xffc   : > { %4552 = vpow2.f32 %v2729_v47 }
0x1007   : > { %v4551_v48 = vpop.eup %4550 }
0x1008   : > { %v2736_v49 = vsel %vm1317_vm3, %v4551_v48, 0.0 }
0x1009   : > { %v4553_v50 = vpop.eup %4552  ;;  %2737 = vadd.xlane.f32.xlu1 %v2736_v49 }
0x100a   : > { %v2733_v51 = vsel %vm1317_vm3, %v4553_v50, 0.0 }
0x100b   : > { %2734 = vadd.xlane.f32.xlu0 %v2733_v51 }
0x101a   : > { %2743 = vrot.lane.b32.xlu1 %v5201_v1, %s5523_s14 }
0x101e   : > { %2836 = vrot.lane.b32.xlu1 %v5199_v62, %s5525_s19 }
0x1021   : > { %2745 = vrot.lane.b32.xlu0 %v5199_v62, %s5523_s14 }
0x1022   : > { %2830 = vrot.lane.b32.xlu1 %v5201_v1, %s5526_s24 }
0x1025   : > { %2834 = vrot.lane.b32.xlu0 %v5201_v1, %s5525_s19  ;;  %s522_s19 = scalar_lea.vmem %s5495_s13, %s4897_s27 }
0x1029   : > { %2832 = vrot.lane.b32.xlu0 %v5199_v62, %s5526_s24 }
0x1092   : > { %v2738_v52 = vpop.xlane.xlu1 %2737 }
0x1093   : > { %4554 = vrcp.f32 %v2738_v52 }
0x1094   : > { %v2735_v53 = vpop.xlane.xlu0 %2734 }
0x1095   : > { %4556 = vrcp.f32 %v2735_v53 }
0x1096   : > { %v2744_v54 = vpop.permute.xlu1 %2743 }
0x1098   : > { %v2746_v55 = vpop.permute.xlu0 %2745 }
0x1099   : > { %4329 = vmatprep.subr.mxu0 %v2746_v55 }
0x109a   : > { %4330 = vmatpush3.msra.mxu0 %v2746_v55  ;;  %v2837_v56 = vpop.permute.xlu1 %2836 }
0x109b   : > { %4331 = vmatprep.subr.mxu0 %v2744_v54 }
0x109c   : > { %4332 = vmatpush3.msra.mxu0 %v2744_v54  ;;  %v2835_v63 = vpop.permute.xlu0 %2834 }
0x109d   : > { %4336 = vmatprep.subr.msk.mxu0 %vm643_vm2, %v2837_v56 }
0x109e   : > { %v2831_v61 = vpop.permute.xlu1 %2830 }
0x10a0   : > { %v4555_v58 = vpop.eup %4554  ;;  %v2833_v2 = vpop.permute.xlu0 %2832 }
0x10a1   : > { %v2742_v60 = vmul.f32 %v4555_v58, %v4551_v48 }
0x10a2   : > { %v4557_v59 = vpop.eup %4556 }
0x10a3   : > { %v2741_v57 = vmul.f32 %v4557_v59, %v4553_v50 }
0x10a5   : > { %4333 = vmatprep.mubr.msk.f32.mxu0 %vm1317_vm3, %v2741_v57 }
0x10a6   : > { %4334 = vmatmul.mubr.msk.f32.vlgmr.msra.gmra.mxu0 %vm1317_vm3, %v2742_v60 }
0x10a7   : > { %4337 = vmatpush3.xpose.msk.msra.mxu0 %vm643_vm2, %v2837_v56  ;;  %4340 = vmatprep.mubr.msk.f32.mxu0 %vm643_vm2, %v2831_v61  ;;  %v4015_v61 = vld [vmem:[%s5488_s6 + $0x58] sm:$0xff] }
0x10a8   : > { %4338 = vmatprep.subr.msk.mxu0 %vm643_vm2, %v2835_v63 }
0x10ab   : > { %4339 = vmatpush3.xpose.msk.msra.mxu0 %vm643_vm2, %v2835_v63  ;;  %v4014_v63 = vld [vmem:[%s5488_s6 + $0x50] sm:$0xff] }
0x10ae   : > { %4341 = vmatmul.mubr.msk.f32.vlgmr.msra.gmra.mxu0 %vm643_vm2, %v2833_v2  ;;  %v4013_v2 = vld [vmem:[%s5488_s6 + $0x48] sm:$0xff] }
0x1166   : > { %v5267_v3 = vpop.f32.mrf.mxu0 }
0x1168   : > { %v5269_v4 = vpop.f32.mrf.mxu0 }
0x116e   : > { %v4342_v5 = vpop.f32.mrf.mxu0 }
0x116f   : > { %v2922_v6 = vmul.f32 0.35355338, %v4342_v5 }
0x1170   : > { %v2912_v7 = vpop.f32.mrf.mxu0 }
0x1171   : > { %v2921_v9 = vmul.f32 0.35355338, %v2912_v7  ;;  %v2926_v11 = vsel %vm1317_vm3, %v2922_v6, -inf }
0x1172   : > { %2927 = vmax.xlane.f32.xlu0 %v2926_v11 }
0x1173   : > { %v2923_v12 = vsel %vm1317_vm3, %v2921_v9, -inf }
0x1174   : > { %2924 = vmax.xlane.f32.xlu1 %v2923_v12 }
0x11fb   : > { %v2928_v13 = vpop.xlane.xlu0 %2927 }
0x11fc   : > { %v2930_v14 = vsub.f32 %v2922_v6, %v2928_v13 }
0x11fd   : > { %v2925_v15 = vpop.xlane.xlu1 %2924 }
0x11fe   : > { %v2933_v16 = vmul.f32 1.442695, %v2930_v14  ;;  %v2929_v17 = vsub.f32 %v2921_v9, %v2925_v15 }
0x1200   : > { %4558 = vpow2.f32 %v2933_v16  ;;  %v2931_v19 = vmul.f32 1.442695, %v2929_v17 }
0x1202   : > { %4560 = vpow2.f32 %v2931_v19 }
0x120d   : > { %v4559_v20 = vpop.eup %4558 }
0x120e   : > { %v2938_v21 = vsel %vm1317_vm3, %v4559_v20, 0.0 }
0x120f   : > { %v4561_v22 = vpop.eup %4560  ;;  %2939 = vadd.xlane.f32.xlu1 %v2938_v21 }
0x1210   : > { %v2935_v23 = vsel %vm1317_vm3, %v4561_v22, 0.0 }
0x1211   : > { %2936 = vadd.xlane.f32.xlu0 %v2935_v23 }
0x1220   : > { %2945 = vrot.lane.b32.xlu1 %v5201_v1, %s5521_s30 }
0x1224   : > { %3038 = vrot.lane.b32.xlu1 %v5199_v62, %s5527_s18 }
0x1227   : > { %2947 = vrot.lane.b32.xlu0 %v5199_v62, %s5521_s30  ;;  %s5529_s30 = smov 16  }
0x1228   : > { %3032 = vrot.lane.b32.xlu1 %v5201_v1, %s5528_s20 }
0x122b   : > { %3036 = vrot.lane.b32.xlu0 %v5201_v1, %s5527_s18 }
0x122f   : > { %3034 = vrot.lane.b32.xlu0 %v5199_v62, %s5528_s20 }
0x1298   : > { %v2940_v24 = vpop.xlane.xlu1 %2939 }
0x1299   : > { %4562 = vrcp.f32 %v2940_v24 }
0x129a   : > { %v2937_v25 = vpop.xlane.xlu0 %2936 }
0x129b   : > { %4564 = vrcp.f32 %v2937_v25 }
0x129c   : > { %v2946_v26 = vpop.permute.xlu1 %2945 }
0x129e   : > { %v2948_v10 = vpop.permute.xlu0 %2947 }
0x129f   : > { %4343 = vmatprep.subr.mxu1 %v2948_v10 }
0x12a0   : > { %4344 = vmatpush3.msra.mxu1 %v2948_v10  ;;  %v3039_v27 = vpop.permute.xlu1 %3038 }
0x12a1   : > { %4345 = vmatprep.subr.mxu1 %v2946_v26 }
0x12a2   : > { %4346 = vmatpush3.msra.mxu1 %v2946_v26  ;;  %v3037_v33 = vpop.permute.xlu0 %3036 }
0x12a3   : > { %4350 = vmatprep.subr.msk.mxu1 %vm643_vm2, %v3039_v27 }
0x12a4   : > { %v3033_v32 = vpop.permute.xlu1 %3032 }
0x12a6   : > { %v4563_v0 = vpop.eup %4562  ;;  %v3035_v36 = vpop.permute.xlu0 %3034 }
0x12a7   : > { %v2944_v30 = vmul.f32 %v4563_v0, %v4559_v20 }
0x12a8   : > { %v4565_v28 = vpop.eup %4564 }
0x12a9   : > { %v2943_v29 = vmul.f32 %v4565_v28, %v4561_v22 }
0x12ab   : > { %4347 = vmatprep.mubr.msk.f32.mxu1 %vm1317_vm3, %v2943_v29 }
0x12ac   : > { %4348 = vmatmul.mubr.msk.f32.vlgmr.msra.gmra.mxu1 %vm1317_vm3, %v2944_v30 }
0x12ad   : > { %4351 = vmatpush3.xpose.msk.msra.mxu1 %vm643_vm2, %v3039_v27  ;;  %4354 = vmatprep.mubr.msk.f32.mxu1 %vm643_vm2, %v3033_v32 }
0x12ae   : > { %4352 = vmatprep.subr.msk.mxu1 %vm643_vm2, %v3037_v33 }
0x12b1   : > { %4353 = vmatpush3.xpose.msk.msra.mxu1 %vm643_vm2, %v3037_v33 }
0x12b2   : > { %4375 = vmatprep.subr.mxu1 %v4708_v8 }
0x12b4   : > { %4355 = vmatmul.mubr.msk.f32.vlgmr.msra.gmra.mxu1 %vm643_vm2, %v3035_v36 }
0x12b5   : > { %4383 = vmatprep.mubr.msk.f32.mxu1 %vm4709_vm1, %v4708_v8 }
0x136c   : > { %v4349_v37 = vpop.f32.mrf.mxu1 }
0x136e   : > { %v3023_v38 = vpop.f32.mrf.mxu1 }
0x1374   : > { %v4356_v39 = vpop.f32.mrf.mxu1 }
0x1375   : > { %v3124_v40 = vmul.f32 0.35355338, %v4356_v39  ;;  %v3392_v39 = vld [vmem:[%s5490_s8 + $0x8] sm:$0xff] }
0x1376   : > { %v3114_v41 = vpop.f32.mrf.mxu1 }
0x1377   : > { %v3123_v42 = vmul.f32 0.35355338, %v3114_v41  ;;  %v3128_v43 = vsel %vm1317_vm3, %v3124_v40, -inf  ;;  %v3483_v41 = vld [vmem:[%s5492_s10 + $0x38] sm:$0xff] }
0x1378   : > { %3129 = vmax.xlane.f32.xlu0 %v3128_v43  ;;  %v3481_v43 = vld [vmem:[%s5492_s10 + $0x28] sm:$0xff] }
0x1379   : > { %v3125_v44 = vsel %vm1317_vm3, %v3123_v42, -inf }
0x137a   : > { %3126 = vmax.xlane.f32.xlu1 %v3125_v44  ;;  %v3480_v44 = vld [vmem:[%s5492_s10 + $0x20] sm:$0xff] }
0x1401   : > { %v3130_v45 = vpop.xlane.xlu0 %3129 }
0x1402   : > { %v3132_v46 = vsub.f32 %v3124_v40, %v3130_v45  ;;  %v3391_v40 = vld [vmem:[%s5490_s8] sm:$0xff]  ;;  %v3479_v45 = vld [vmem:[%s5492_s10 + $0x18] sm:$0xff] }
0x1403   : > { %v3127_v47 = vpop.xlane.xlu1 %3126 }
0x1404   : > { %v3135_v48 = vmul.f32 1.442695, %v3132_v46  ;;  %v3131_v49 = vsub.f32 %v3123_v42, %v3127_v47  ;;  %v3482_v42 = vld [vmem:[%s5492_s10 + $0x30] sm:$0xff] }
0x1406   : > { %4566 = vpow2.f32 %v3135_v48  ;;  %v3133_v50 = vmul.f32 1.442695, %v3131_v49 }
0x1408   : > { %4568 = vpow2.f32 %v3133_v50 }
0x1413   : > { %v4567_v51 = vpop.eup %4566 }
0x1414   : > { %v3140_v52 = vsel %vm1317_vm3, %v4567_v51, 0.0 }
0x1415   : > { %v4569_v53 = vpop.eup %4568  ;;  %3141 = vadd.xlane.f32.xlu1 %v3140_v52 }
0x1416   : > { %v3137_v54 = vsel %vm1317_vm3, %v4569_v53, 0.0 }
0x1417   : > { %3138 = vadd.xlane.f32.xlu0 %v3137_v54 }
0x1426   : > { %3147 = vrot.lane.b32.xlu1 %v5201_v1, %s5522_s29 }
0x142a   : > { %3236 = vrot.lane.b32.xlu1 %v5269_v4, %s4721_s21 }
0x142d   : > { %3149 = vrot.lane.b32.xlu0 %v5199_v62, %s5522_s29 }
0x142e   : > { %3244 = vrot.lane.b32.xlu1 %v3023_v38, %s5529_s30  ;;  %v3393_v38 = vld [vmem:[%s5490_s8 + $0x10] sm:$0xff] }
0x1431   : > { %3238 = vrot.lane.b32.xlu0 %v5267_v3, %s4721_s21  ;;  %v4012_v3 = vld [vmem:[%s5488_s6 + $0x40] sm:$0xff] }
0x1435   : > { %3246 = vrot.lane.b32.xlu0 %v4349_v37, %s5529_s30  ;;  %v3394_v37 = vld [vmem:[%s5490_s8 + $0x18] sm:$0xff] }
0x1436   : > { %4376 = vmatpush3.msra.mxu1 %v3394_v37 }
0x1437   : > { %4377 = vmatprep.subr.mxu1 %v4708_v8 }
0x1438   : > { %4378 = vmatpush3.msra.mxu1 %v3393_v38 }
0x1439   : > { %4379 = vmatprep.subr.mxu1 %v4708_v8 }
0x143a   : > { %4380 = vmatpush3.msra.mxu1 %v3392_v39 }
0x143b   : > { %4381 = vmatprep.subr.mxu1 %v4708_v8 }
0x143c   : > { %4382 = vmatpush3.msra.mxu1 %v3391_v40 }
0x143d   : > { %4405 = vmatprep.subr.mxu1 %v4708_v8 }
0x149e   : > { %v3142_v55 = vpop.xlane.xlu1 %3141 }
0x149f   : > { %4570 = vrcp.f32 %v3142_v55 }
0x14a0   : > { %v3139_v56 = vpop.xlane.xlu0 %3138 }
0x14a1   : > { %4572 = vrcp.f32 %v3139_v56  ;;  %v4022_v56 = vld [vmem:[%s5485_s3 + $0x3] ss:$0 sm:$0xff] }
0x14a2   : > { %v3148_v1 = vpop.permute.xlu1 %3147 }
0x14a4   : > { %v3150_v58 = vpop.permute.xlu0 %3149 }
0x14a5   : > { %4357 = vmatprep.subr.mxu0 %v3150_v58 }
0x14a6   : > { %4358 = vmatpush3.msra.mxu0 %v3150_v58  ;;  %v3237_v7 = vpop.permute.xlu1 %3236 }
0x14a7   : > { %4359 = vmatprep.subr.mxu0 %v3148_v1  ;;  %v3258_v12 = vsel %vm643_vm2, %v5241_v35, %v3237_v7  ;;  %v4016_v35 = vld [vmem:[#allocation4 + $0x2] ss:$0 sm:$0xff]  ;;  %v3478_v7 = vld [vmem:[%s5492_s10 + $0x10] sm:$0xff] }
0x14a8   : > { %4360 = vmatpush3.msra.mxu0 %v3148_v1  ;;  %v3239_v6 = vpop.permute.xlu0 %3238 }
0x14a9   : > { %4364 = vmatprep.subr.mxu0 %v4015_v61  ;;  %v3259_v14 = vsel %vm643_vm2, %v5239_v34, %v3239_v6  ;;  %v4043_v6 = vld [vmem:[%s5492_s10 + $0x70] sm:$0xff] }
0x14aa   : > { %v3245_v11 = vpop.permute.xlu1 %3244 }
0x14ab   : > { %v3260_v15 = vsel %vm1317_vm3, %v3258_v12, %v3245_v11  ;;  %v3477_v11 = vld [vmem:[%s5492_s10 + $0x8] sm:$0xff]  ;;  %v4041_v12 = vld [vmem:[%s5492_s10 + $0x60] sm:$0xff] }
0x14ac   : > { %v4571_v59 = vpop.eup %4570  ;;  %v3247_v9 = vpop.permute.xlu0 %3246 }
0x14ad   : > { %v3146_v60 = vmul.f32 %v4571_v59, %v4567_v51  ;;  %v3261_v17 = vsel %vm1317_vm3, %v3259_v14, %v3247_v9  ;;  %v4042_v9 = vld [vmem:[%s5492_s10 + $0x68] sm:$0xff]  ;;  %v4040_v14 = vld [vmem:[%s5492_s10 + $0x58] sm:$0xff] }
0x14ae   : > { %v4573_v57 = vpop.eup %4572 }
0x14af   : > { %v3145_v62 = vmul.f32 %v4573_v57, %v4569_v53  ;;  %v4021_v53 = vld [vmem:[%s5484_s2 + $0x3] ss:$0 sm:$0xff]  ;;  %v4034_v57 = vld [vmem:[%s5490_s8 + $0x38] sm:$0xff] }
0x14b1   : > { %4361 = vmatprep.mubr.msk.f32.mxu0 %vm1317_vm3, %v3145_v62  ;;  %v4029_v62 = vld [vmem:[%s5484_s2 + $0x4] ss:$0 sm:$0xff] }
0x14b2   : > { %4362 = vmatmul.mubr.msk.f32.vlgmr.msra.gmra.mxu0 %vm1317_vm3, %v3146_v60  ;;  %v4033_v60 = vld [vmem:[%s5490_s8 + $0x30] sm:$0xff] }
0x14b3   : > { %4365 = vmatpush3.msra.mxu0 %v4015_v61  ;;  %v4032_v61 = vld [vmem:[%s5490_s8 + $0x28] sm:$0xff] }
0x14b4   : > { %4366 = vmatprep.subr.mxu0 %v4014_v63 }
0x14b5   : > { %4367 = vmatpush3.msra.mxu0 %v4014_v63 }
0x14b6   : > { %4368 = vmatprep.subr.mxu0 %v4013_v2 }
0x14b7   : > { %4369 = vmatpush3.msra.mxu0 %v4013_v2  ;;  %v4030_v2 = vld [vmem:[%s5485_s3 + $0x4] ss:$0 sm:$0xff] }
0x14b8   : > { %4370 = vmatprep.subr.mxu0 %v4012_v3 }
0x14b9   : > { %4371 = vmatpush3.msra.mxu0 %v4012_v3  ;;  %v4031_v3 = vld [vmem:[%s5490_s8 + $0x20] sm:$0xff] }
0x14ba   : > { %4386 = vmatprep.subr.mxu0 %v4708_v8 }
0x1572   : > { %v4363_v4 = vpop.f32.mrf.mxu0 }
0x1573   : > { %3254 = vrot.lane.b32.xlu0 %v4363_v4, %s5530_s23 }
0x1574   : > { %v3225_v5 = vpop.f32.mrf.mxu0 }
0x1575   : > { %3252 = vrot.lane.b32.xlu1 %v3225_v5, %s5530_s23  ;;  %v4044_v5 = vld [vmem:[%s5492_s10 + $0x78] sm:$0xff] }
0x15e5   : > { %v3255_v13 = vpop.permute.xlu0 %3254 }
0x15e6   : > { %v3263_v20 = vsel %vm1319_vm4, %v3261_v17, %v3255_v13  ;;  %v3476_v13 = vld [vmem:[%s5492_s10] sm:$0xff] }
0x15e7   : > { %v3253_v16 = vpop.permute.xlu1 %3252  ;;  %v4037_v17 = vld [vmem:[%s5492_s10 + $0x40] sm:$0xff] }
0x15e8   : > { %v3262_v19 = vsel %vm1319_vm4, %v3260_v15, %v3253_v16  ;;  %v4039_v15 = vld [vmem:[%s5492_s10 + $0x50] sm:$0xff]  ;;  %v4038_v16 = vld [vmem:[%s5492_s10 + $0x48] sm:$0xff] }
0x15e9   : > { %4372 = vmatprep.mubr.msk.f32.mxu0 %vm527_vm0, %v3262_v19  ;;  %v4023_v19 = vld [vmem:[#allocation6] ss:$0 sm:$0xff] }
0x15ea   : > { %4373 = vmatmul.mubr.msk.f32.vlgmr.msra.gmra.mxu0 %vm527_vm0, %v3263_v20 }
0x15eb   : > { %4402 = vmatprep.mubr.msk.f32.mxu0 %vm4709_vm1, %v4708_v8  ;;  %4387 = vmatpush3.msra.mxu0 %v3483_v41 }
0x15ec   : > { %4388 = vmatprep.subr.mxu0 %v4708_v8 }
0x15ed   : > { %4389 = vmatpush3.msra.mxu0 %v3482_v42 }
0x15ee   : > { %4390 = vmatprep.subr.mxu0 %v4708_v8 }
0x15ef   : > { %4391 = vmatpush3.msra.mxu0 %v3481_v43 }
0x15f0   : > { %4392 = vmatprep.subr.mxu0 %v4708_v8 }
0x15f1   : > { %4393 = vmatpush3.msra.mxu0 %v3480_v44 }
0x15f2   : > { %4394 = vmatprep.subr.mxu0 %v4708_v8 }
0x15f3   : > { %4395 = vmatpush3.msra.mxu0 %v3479_v45 }
0x15f4   : > { %4396 = vmatprep.subr.mxu0 %v4708_v8 }
0x15f5   : > { %4397 = vmatpush3.msra.mxu0 %v3478_v7 }
0x15f6   : > { %4398 = vmatprep.subr.mxu0 %v4708_v8 }
0x15f7   : > { %4399 = vmatpush3.msra.mxu0 %v3477_v11 }
0x15f8   : > { %4400 = vmatprep.subr.mxu0 %v4708_v8 }
0x15f9   : > { %4401 = vmatpush3.msra.mxu0 %v3476_v13 }
0x16aa   : > { %v4374_v21 = vpop.f32.mrf.mxu0 }
0x16ab   : > { %v3355_v22 = vadd.f32 %v4374_v21, %v4016_v35 }
0x16ac   : > { %v3349_v34 = vpop.f32.mrf.mxu0 }
0x16ad   : > { %v5342_v23 = vadd.f32 %v3355_v22, %v5172_v31  ;;  %v3350_v24 = vadd.f32 %v4016_v35, %v3349_v34  ;;  %v4035_v34 = vld [vmem:[#allocation6 + $0x1] ss:$0 sm:$0xff] }
0x16af   : > { %v5345_v25 = vadd.f32 %v3350_v24, %v5162_v18  ;;  %v3570_v26 = vsel %vm527_vm0, %v5342_v23, 0.0 }
0x16b0   : > { %3571 = vadd.xlane.f32.xlu0 %v3570_v26 }
0x16b1   : > { %v3364_v10 = vsel %vm527_vm0, %v5345_v25, 0.0 }
0x16b2   : > { %3365 = vadd.xlane.f32.xlu1 %v3364_v10 }
0x1739   : > { %v3572_v27 = vpop.xlane.xlu0 %3571 }
0x173a   : > { %v3573_v0 = vmul.f32 0.03125, %v3572_v27 }
0x173b   : > { %v3366_v28 = vpop.xlane.xlu1 %3365 }
0x173c   : > { %v3574_v29 = vsub.f32 %v5342_v23, %v3573_v0  ;;  %v3367_v30 = vmul.f32 0.03125, %v3366_v28 }
0x173e   : > { %v3368_v31 = vsub.f32 %v5345_v25, %v3367_v30  ;;  %v3575_v32 = vmul.f32 %v3574_v29, %v3574_v29 }
0x1740   : > { %v3576_v18 = vsel %vm527_vm0, %v3575_v32, 0.0  ;;  %v3369_v33 = vmul.f32 %v3368_v31, %v3368_v31 }
0x1741   : > { %3577 = vadd.xlane.f32.xlu1 %v3576_v18 }
0x1742   : > { %v3370_v36 = vsel %vm527_vm0, %v3369_v33, 0.0 }
0x1743   : > { %3371 = vadd.xlane.f32.xlu0 %v3370_v36 }
0x17ca   : > { %v3578_v46 = vpop.xlane.xlu1 %3577 }
0x17cb   : > { %v3579_v47 = vmul.f32 0.03125, %v3578_v46 }
0x17cc   : > { %v3372_v48 = vpop.xlane.xlu0 %3371 }
0x17cd   : > { %v3373_v49 = vmul.f32 0.03125, %v3372_v48  ;;  %v3580_v50 = vadd.f32 1e-05, %v3579_v47 }
0x17cf   : > { %v3374_v51 = vadd.f32 1e-05, %v3373_v49 }
0x17d1   : > { %4574 = vrsqrt.f32 %v3374_v51 }
0x17d2   : > { %4576 = vrsqrt.f32 %v3580_v50 }
0x17de   : > { %v4575_v52 = vpop.eup %4574 }
0x17df   : > { %v3376_v54 = vmul.f32 %v4575_v52, %v3368_v31  ;;  %v4577_v55 = vpop.eup %4576  ;;  %v4045_v31 = vld [vmem:[#allocation7 + $0x1] ss:$0 sm:$0xff] }
0x17e0   : > { %v3582_v1 = vmul.f32 %v4577_v55, %v3574_v29 }
0x17e1   : > { %v3383_v58 = vmul.f32 %v4021_v53, %v3376_v54 }
0x17e2   : > { %v3589_v63 = vmul.f32 %v4029_v62, %v3582_v1 }
0x17e3   : > { %v3390_v59 = vadd.f32 %v4022_v56, %v3383_v58 }
0x17e4   : > { %v3596_v4 = vadd.f32 %v4030_v2, %v3589_v63 }
0x17e5   : > { %4384 = vmatmul.mubr.msk.f32.vlgmr.msra.gmra.mxu1 %vm527_vm0, %v3390_v59 }
0x17e6   : > { %4406 = vmatpush3.msra.mxu1 %v4034_v57  ;;  %4413 = vmatprep.mubr.msk.f32.mxu1 %vm4709_vm1, %v4708_v8 }
0x17e7   : > { %4407 = vmatprep.subr.mxu1 %v4708_v8 }
0x17e8   : > { %4408 = vmatpush3.msra.mxu1 %v4033_v60 }
0x17e9   : > { %4409 = vmatprep.subr.mxu1 %v4708_v8 }
0x17ea   : > { %4410 = vmatpush3.msra.mxu1 %v4032_v61 }
0x17eb   : > { %4411 = vmatprep.subr.mxu1 %v4708_v8 }
0x17ec   : > { %4412 = vmatpush3.msra.mxu1 %v4031_v3 }
0x17ed   : > { %4414 = vmatmul.mubr.msk.f32.vlgmr.msra.gmra.mxu1 %vm527_vm0, %v3596_v4  ;;  %4416 = vmatprep.subr.mxu1 %v4708_v8 }
0x17ee   : > { %4417 = vmatpush3.msra.mxu1 %v4044_v5  ;;  %4432 = vmatprep.mubr.msk.f32.mxu1 %vm4709_vm1, %v4708_v8 }
0x17ef   : > { %4418 = vmatprep.subr.mxu1 %v4708_v8 }
0x17f0   : > { %4419 = vmatpush3.msra.mxu1 %v4043_v6 }
0x17f1   : > { %4420 = vmatprep.subr.mxu1 %v4708_v8 }
0x17f2   : > { %4421 = vmatpush3.msra.mxu1 %v4042_v9 }
0x17f3   : > { %4422 = vmatprep.subr.mxu1 %v4708_v8 }
0x17f4   : > { %4423 = vmatpush3.msra.mxu1 %v4041_v12 }
0x17f5   : > { %4424 = vmatprep.subr.mxu1 %v4708_v8 }
0x17f6   : > { %4425 = vmatpush3.msra.mxu1 %v4040_v14 }
0x17f7   : > { %4426 = vmatprep.subr.mxu1 %v4708_v8 }
0x17f8   : > { %4427 = vmatpush3.msra.mxu1 %v4039_v15 }
0x17f9   : > { %4428 = vmatprep.subr.mxu1 %v4708_v8 }
0x17fa   : > { %4429 = vmatpush3.msra.mxu1 %v4038_v16 }
0x17fb   : > { %4430 = vmatprep.subr.mxu1 %v4708_v8  ;;  %v4025_v8 = vld [vmem:[#allocation7] ss:$0 sm:$0xff] }
0x17fc   : > { %4431 = vmatpush3.msra.mxu1 %v4037_v17 }
0x18a5   : > { %v3471_v20 = vpop.f32.mrf.mxu1 }
0x18a6   : > { %v3472_v35 = vadd.f32 %v4023_v19, %v3471_v20 }
0x18a7   : > { %v4385_v21 = vpop.f32.mrf.mxu1 }
0x18a8   : > { %v3475_v22 = vmax.f32 %v3472_v35, 0.0 }
0x18aa   : > { %4403 = vmatmul.mubr.msk.f32.vlgmr.msra.gmra.mxu0 %vm3491_vm5, %v3475_v22 }
0x18ad   : > { %v3679_v24 = vpop.f32.mrf.mxu1 }
0x18ae   : > { %v3680_v26 = vadd.f32 %v4035_v34, %v3679_v24 }
0x18af   : > { %v4415_v10 = vpop.f32.mrf.mxu1 }
0x18b0   : > { %v3683_v27 = vmax.f32 %v3680_v26, 0.0 }
0x18b2   : > { %4433 = vmatmul.mubr.msk.f32.vlgmr.msra.gmra.mxu1 %vm3491_vm5, %v3683_v27 }
0x196a   : > { %v3561_v0 = vpop.f32.mrf.mxu0 }
0x196b   : > { %v3562_v28 = vadd.f32 %v4025_v8, %v3561_v0 }
0x196c   : > { %v4404_v29 = vpop.f32.mrf.mxu0 }
0x196d   : > { %v3565_v30 = vadd.f32 %v3562_v28, %v5345_v25 }
0x196f   : > { %3775 = vst.msk [vmem:[%s518_s22] sm:$0xff] %vm527_vm0, %v3565_v30 }
0x1972   : > { %v3770_v32 = vpop.f32.mrf.mxu1 }
0x1973   : > { %v3771_v18 = vadd.f32 %v4045_v31, %v3770_v32 }
0x1974   : > { %v4434_v33 = vpop.f32.mrf.mxu1 }
0x1975   : > { %v3774_v36 = vadd.f32 %v3771_v18, %v5342_v23 }
0x1977   : > { %3776 = vst.msk [vmem:[%s522_s19] sm:$0xff] %vm527_vm0, %v3774_v36 }
0x1978 PF: > { %s27_s25 = sadd.s32 1, %s4700_s25  }
0x1979   : > { %p24_p2 = scmp.ge.s32.totalorder %s27_s25, 4  }
0x197b   :  { %26 = sbr.rel (!%p24_p2) target bundleno = 3 (0x3), region = 150 }
0x1980   :  { %3810 = vsyncpa [#allocation3], 1 }
0x1981   :  { %3812 = vsyncpa [#allocation3 + $0x1], 1 }
0x1982   :  { %3813 = vsyncpa [#allocation5], 1 }
0x1983   :  { %3814 = vsyncpa [#allocation8], 1 }

</bundles_post_ra>
